<compile_context>
chip_gen: v6e
topology: v6e:2x2x1
jax: 0.10.0
libtpu: 0.0.40
codegen_flags: <defaults>
</compile_context>

<pallas_src>
import numpy as np
import jax
import jax.numpy as jnp
from jax.experimental import pallas as pl
from jax.experimental.pallas import tpu as pltpu

_PI = float(np.pi)
_BF16 = jnp.bfloat16
_F32 = jnp.float32


# ----------------------------------------------------------------------------- #
# In-kernel math helpers (only guaranteed-supported Mosaic elementwise primitives).
# ----------------------------------------------------------------------------- #
def _atan_unit(a):
    """atan(a) for a in [0, 1]: two half-angle reductions + short odd series.

    Uses only sqrt / div / mul / add so it lowers on every TPU generation.
    After two reductions the argument is <= tan(pi/16) ~ 0.199, so the series
    truncation error is < 2e-9 rad (below f32 resolution for this use).
    """
    a = a / (1.0 + jnp.sqrt(1.0 + a * a))
    a = a / (1.0 + jnp.sqrt(1.0 + a * a))
    s = a * a
    p = a * (1.0 + s * (-1.0 / 3.0 + s * (1.0 / 5.0 + s * (-1.0 / 7.0 + s * (1.0 / 9.0)))))
    return 4.0 * p


def _atan2(y, x):
    """Elementwise atan2(y, x) matching np.arctan2 up to ~2e-9 rad."""
    ax = jnp.abs(x)
    ay = jnp.abs(y)
    hi = jnp.maximum(ax, ay)
    lo = jnp.minimum(ax, ay)
    a = lo / jnp.maximum(hi, 1e-30)
    r = _atan_unit(a)
    r = jnp.where(ay > ax, (_PI / 2.0) - r, r)
    r = jnp.where(x < 0.0, _PI - r, r)
    return jnp.where(y < 0.0, -r, r)


def _kara_cmatmul(ar, ai, br, bi):
    """(ar + i*ai) @ (br + i*bi) via 3 real MXU matmuls (Karatsuba).

    Sums are formed in the source dtype (f32 for intermediates) and rounded to bf16
    once; matmul operands are bf16 (native MXU datapath) with f32 accumulation.
    """
    asum = (ar + ai).astype(_BF16)
    bsum = (br + bi).astype(_BF16)
    ar = ar.astype(_BF16)
    ai = ai.astype(_BF16)
    br = br.astype(_BF16)
    bi = bi.astype(_BF16)
    p1 = jnp.dot(ar, br, preferred_element_type=_F32)
    p2 = jnp.dot(ai, bi, preferred_element_type=_F32)
    p3 = jnp.dot(asum, bsum, preferred_element_type=_F32)
    return p1 - p2, p3 - p1 - p2


# ----------------------------------------------------------------------------- #
# Pallas kernel: one (wavelength, profile) field per grid point.
# ----------------------------------------------------------------------------- #
def _asm_matrix_kernel(ur_ref, ui_ref,
                       fy_re_ref, fy_im_ref, fx_re_ref, fx_im_ref,
                       ify_re_ref, ify_im_ref, ifx_re_ref, ifx_im_ref,
                       h_re_ref, h_im_ref,
                       amp_ref, phase_ref):
    # Field arrives as a precomputed complex pair (bf16): aperture multiply and
    # cos/sin were hoisted to the wrapper and are NOT replicated over wavelength.
    ur = ur_ref[...]
    ui = ui_ref[...]

    # Forward angular spectrum:  A = Fy @ U @ Fx  (unnormalized DFT, fft2 convention).
    tr, ti = _kara_cmatmul(fy_re_ref[...], fy_im_ref[...], ur, ui)
    ar_, ai_ = _kara_cmatmul(tr, ti, fx_re_ref[...], fx_im_ref[...])

    # Per-wavelength ASM transfer function — elementwise, f32 (v5e VPU has no bf16 path).
    hr = h_re_ref[...]
    hi = h_im_ref[...]
    br_ = ar_ * hr - ai_ * hi
    bi_ = ar_ * hi + ai_ * hr

    # Inverse transform:  u_out = IFy @ B @ IFx  (1/(H*W) folded into IFy/IFx).
    sr, si = _kara_cmatmul(ify_re_ref[...], ify_im_ref[...], br_, bi_)
    outr, outi = _kara_cmatmul(sr, si, ifx_re_ref[...], ifx_im_ref[...])

    # Fused magnitude/angle epilogue — avoids writing re/im to HBM and re-reading them.
    amp_ref[...] = jnp.sqrt(outr * outr + outi * outi)
    phase_ref[...] = _atan2(outi, outr)


# ----------------------------------------------------------------------------- #
# Deterministic parameter / operator construction (plain numpy, done once).
# ----------------------------------------------------------------------------- #
def _dft_matrices(n):
    idx = np.arange(n)
    ang = -2.0 * np.pi * np.outer(idx, idx) / n
    fwd = np.cos(ang) + 1j * np.sin(ang)          # unnormalized forward DFT
    inv = np.conj(fwd) / n                        # 1/N-normalized inverse DFT
    return fwd.astype(np.complex64), inv.astype(np.complex64)


def _asm_transfer_function(wavelengths_m, h, w, dy_m, dx_m, distance_m):
    fy = np.fft.fftfreq(h, d=dy_m)                # unshifted FFT frequency ordering
    fx = np.fft.fftfreq(w, d=dx_m)
    fy2 = (fy ** 2)[None, :, None]
    fx2 = (fx ** 2)[None, None, :]
    lam = np.asarray(wavelengths_m, dtype=np.float64)[:, None, None]
    arg = (1.0 / lam) ** 2 - fy2 - fx2
    prop = arg > 0.0
    kz = 2.0 * np.pi * np.sqrt(np.where(prop, arg, 0.0))
    hfn = np.where(prop, np.exp(1j * kz * distance_m), 0.0 + 0.0j)   # drop evanescent waves
    return hfn.astype(np.complex64)               # (L, H, W)


def _gen_aperture_disk(h, w, dy_m, dx_m, radius_m):
    y = (np.arange(h) - (h - 1) / 2.0) * dy_m
    x = (np.arange(w) - (w - 1) / 2.0) * dx_m
    rr = np.sqrt(y[:, None] ** 2 + x[None, :] ** 2)
    return (rr <= radius_m).astype(np.float32)[None]   # (1, H, W)


def _vmem_limit_bytes(h, w):
    """Scoped-VMEM budget from the actual per-step footprint (with pipelining headroom)."""
    operators = (4 * h * h + 4 * w * w) * 2                        # fy/ify, fx/ifx re+im (bf16)
    streams = 2 * (2 * h * w * 2 + 2 * h * w * 4 + 2 * h * w * 4)  # (ur,ui)+(hr,hi)+(amp,phase), x2 buffers
    live = 16 * h * w * 4                                          # in-flight f32 intermediates
    need = 2 * operators + streams + live
    # TODO(synk): for very large fields (H=W>~1024 on v7x's 64 MiB VMEM) the invariant operator
    # planes should additionally be single-buffered (pl.Buffered(1)) or the Fy/IFy stages row-tiled.
    return int(min(max(need, 32 * 1024 * 1024), 64 * 1024 * 1024))


# ----------------------------------------------------------------------------- #
# Layer wrapper (mirrors the PyTorch module's forward semantics).
# ----------------------------------------------------------------------------- #
class PropagatePlanesLayerMatrixBroadband:
    def __init__(self, parameters):
        if parameters["diffractionEngine"] != "ASM_fourier":
            raise ValueError("Only ASM_fourier diffraction engine is supported.")
        self.parameters = parameters
        self.wavelength_set_m = np.asarray(parameters["wavelength_set_m"], dtype=np.float64)
        h = parameters["ms_samplesM"]["y"]
        w = parameters["ms_samplesM"]["x"]
        self.h, self.w = h, w
        self.dy_m = parameters["ms_dx_m"]["y"]
        self.dx_m = parameters["ms_dx_m"]["x"]
        self.distance_m = parameters["sensor_distance_m"]
        self.aperture_trans = jnp.asarray(
            _gen_aperture_disk(h, w, self.dy_m, self.dx_m, parameters["radius_m"]))

        fy, ify = _dft_matrices(h)
        fx, ifx = _dft_matrices(w)
        hfn = _asm_transfer_function(self.wavelength_set_m, h, w,
                                     self.dy_m, self.dx_m, self.distance_m)
        planes = lambda z, dt: (jnp.asarray(np.real(z), dt), jnp.asarray(np.imag(z), dt))
        # DFT/IDFT operators feed the MXU -> store bf16 (f32 accumulation in-kernel).
        self.fy_re, self.fy_im = planes(fy, _BF16)
        self.fx_re, self.fx_im = planes(fx, _BF16)
        self.ify_re, self.ify_im = planes(ify, _BF16)
        self.ifx_re, self.ifx_im = planes(ifx, _BF16)
        # Transfer function only used elementwise -> keep f32.
        self.h_re, self.h_im = planes(hfn, _F32)

    def __call__(self, inputs, point_source_locs=None, sim_wavelengths_m=None,
                 batch_loop=False):
        # TODO(synk): sim_wavelengths_m override and batch_loop helper are not reimplemented.
        return self.forward(inputs, point_source_locs)

    def forward(self, inputs, point_source_locs=None):
        # TODO(synk): point-source spherical-wavefront illumination, sqrt_energy_illum
        # normalization and sensor-grid resampling (prop_params regeneration) are not
        # reimplemented; this propagates aperture*field to the sensor plane and returns
        # (|u_out|, angle(u_out)) on the metasurface grid.
        amp_in = jnp.asarray(inputs[0], _F32)
        phase_in = jnp.asarray(inputs[1], _F32)
        if amp_in.ndim == 3:                        # (B, H, W) -> (1, B, H, W) shared profiles
            amp_in = amp_in[None]
            phase_in = phase_in[None]
        lf = amp_in.shape[0]
        num_l = int(self.wavelength_set_m.shape[0])
        if lf not in (1, num_l):
            raise ValueError("Leading dim must be 1 or len(wavelength_set_m).")
        b = amp_in.shape[1]
        h, w = self.h, self.w

        # Hoisted prologue: aperture * amplitude -> complex field, computed ONCE
        # (not per wavelength grid point), stored bf16 for the MXU.
        a_ap = amp_in * self.aperture_trans[0]
        ur = (a_ap * jnp.cos(phase_in)).astype(_BF16)
        ui = (a_ap * jnp.sin(phase_in)).astype(_BF16)

        # Field index map: reuse the single copy per wavelength when profiles are shared
        # (no L-fold broadcast / extra HBM traffic).
        if lf == num_l:
            field_in_map = lambda l, bb: (l, bb, 0, 0)
        else:
            field_in_map = lambda l, bb: (0, bb, 0, 0)
        field_in_spec = pl.BlockSpec((None, None, h, w), field_in_map)
        out_spec = pl.BlockSpec((None, None, h, w), lambda l, bb: (l, bb, 0, 0))
        mat_h_spec = pl.BlockSpec((h, h), lambda l, bb: (0, 0))
        mat_w_spec = pl.BlockSpec((w, w), lambda l, bb: (0, 0))
        tf_spec = pl.BlockSpec((None, h, w), lambda l, bb: (l, 0, 0))

        # 4 complex stages x 3 real Karatsuba matmuls each; 2 flops per MAC.
        flops = 2 * 12 * h * w * (h + w) * num_l * b
        bytes_accessed = (2 * lf * b * h * w * 2            # ur, ui (bf16)
                          + (4 * h * h + 4 * w * w) * 2     # DFT/IDFT planes (bf16)
                          + 2 * num_l * h * w * 4           # transfer function (f32)
                          + 2 * num_l * b * h * w * 4)      # amp, phase outputs (f32)
        cost = pl.CostEstimate(flops=flops,
                               transcendentals=6 * num_l * b * h * w,
                               bytes_accessed=bytes_accessed)

        out_amp, out_phase = pl.pallas_call(
            _asm_matrix_kernel,
            out_shape=(jax.ShapeDtypeStruct((num_l, b, h, w), _F32),
                       jax.ShapeDtypeStruct((num_l, b, h, w), _F32)),
            grid_spec=pltpu.PrefetchScalarGridSpec(
                num_scalar_prefetch=0,
                grid=(num_l, b),
                in_specs=[field_in_spec, field_in_spec,
                          mat_h_spec, mat_h_spec, mat_w_spec, mat_w_spec,
                          mat_h_spec, mat_h_spec, mat_w_spec, mat_w_spec,
                          tf_spec, tf_spec],
                out_specs=[out_spec, out_spec],
            ),
            compiler_params=pltpu.CompilerParams(
                dimension_semantics=("parallel", "parallel"),
                vmem_limit_bytes=_vmem_limit_bytes(h, w)),
            cost_estimate=cost,
        )(ur, ui,
          self.fy_re, self.fy_im, self.fx_re, self.fx_im,
          self.ify_re, self.ify_im, self.ifx_re, self.ifx_im,
          self.h_re, self.h_im)
        return out_amp, out_phase


# ----------------------------------------------------------------------------- #
# Demo / self-check
# ----------------------------------------------------------------------------- #
if __name__ == "__main__":
    L, B, H, W = 3, 2, 16, 16
    parameters = {
        "diffractionEngine": "ASM_fourier",
        "wavelength_set_m": [450e-9, 550e-9, 650e-9],
        "ms_samplesM": {"y": H, "x": W},
        "ms_dx_m": {"y": 500e-9, "x": 500e-9},
        "sensor_distance_m": 10e-6,
        "sensor_dx_m": {"y": 500e-9, "x": 500e-9},
        "sensor_pixel_number": {"y": H, "x": W},
        "radius_m": 0.45 * H * 500e-9,
        "dtype": jnp.float32,
    }
    layer = PropagatePlanesLayerMatrixBroadband(parameters)

    key = jax.random.PRNGKey(0)
    k1, k2 = jax.random.split(key)
    field_amplitude = jax.random.uniform(k1, (L, B, H, W), dtype=jnp.float32)
    field_phase = jax.random.uniform(k2, (L, B, H, W), dtype=jnp.float32,
                                     minval=-np.pi, maxval=np.pi)

    out_amp, out_phase = layer([field_amplitude, field_phase])
    jax.block_until_ready((out_amp, out_phase))
    assert out_amp.shape == (L, B, H, W) and out_phase.shape == (L, B, H, W)
    kernel_c = out_amp * jnp.exp(1j * out_phase.astype(jnp.complex64))

    # --- Check 1: exact f32 FFT-based ASM reference (physics / semantics, loose tol
    #     because the kernel intentionally runs bf16 matmuls with f32 accumulation). ---
    ap = layer.aperture_trans[0][None, None]
    u = (field_amplitude * ap) * jnp.exp(1j * field_phase.astype(jnp.complex64))
    hfn = (layer.h_re + 1j * layer.h_im)[:, None]
    u_fft = jnp.fft.ifft2(jnp.fft.fft2(u) * hfn)
    err_fft = float(jnp.max(jnp.abs(kernel_c - u_fft)))
    assert err_fft < 5e-2, f"mismatch vs f32 FFT reference: {err_fft}"

    # --- Check 2: same-precision mirror (bf16 operands / f32 accumulation, identical
    #     rounding points as the kernel) — validates the Pallas plumbing tightly. ---
    def _kara_ref(ar, ai, br, bi):
        asum = (ar + ai).astype(_BF16)
        bsum = (br + bi).astype(_BF16)
        ar = ar.astype(_BF16); ai = ai.astype(_BF16)
        br = br.astype(_BF16); bi = bi.astype(_BF16)
        mm = lambda x, y: jnp.matmul(x, y, preferred_element_type=_F32)
        p1, p2, p3 = mm(ar, br), mm(ai, bi), mm(asum, bsum)
        return p1 - p2, p3 - p1 - p2

    a_ap = field_amplitude * ap
    ur_r = (a_ap * jnp.cos(field_phase)).astype(_BF16)
    ui_r = (a_ap * jnp.sin(field_phase)).astype(_BF16)
    tr, ti = _kara_ref(layer.fy_re, layer.fy_im, ur_r, ui_r)
    ar_, ai_ = _kara_ref(tr, ti, layer.fx_re, layer.fx_im)
    hr, hi = layer.h_re[:, None], layer.h_im[:, None]
    br_, bi_ = ar_ * hr - ai_ * hi, ar_ * hi + ai_ * hr
    sr, si = _kara_ref(layer.ify_re, layer.ify_im, br_, bi_)
    rr, ri = _kara_ref(sr, si, layer.ifx_re, layer.ifx_im)
    ref_c = rr + 1j * ri
    err_mirror = float(jnp.max(jnp.abs(kernel_c - ref_c)))
    assert err_mirror < 2e-3, f"mismatch vs same-precision reference: {err_mirror}"

    print("KERNEL_OK")
</pallas_src>

<mosaic_0001>
module attributes {stable_mosaic.version = 11 : i64} {
  func.func @_asm_matrix_kernel(%arg0: i32, %arg1: i32, %arg2: memref<1x1x16x16xbf16, #tpu.memory_space<vmem>>, %arg3: memref<1x1x16x16xbf16, #tpu.memory_space<vmem>>, %arg4: memref<16x16xbf16, #tpu.memory_space<vmem>>, %arg5: memref<16x16xbf16, #tpu.memory_space<vmem>>, %arg6: memref<16x16xbf16, #tpu.memory_space<vmem>>, %arg7: memref<16x16xbf16, #tpu.memory_space<vmem>>, %arg8: memref<16x16xbf16, #tpu.memory_space<vmem>>, %arg9: memref<16x16xbf16, #tpu.memory_space<vmem>>, %arg10: memref<16x16xbf16, #tpu.memory_space<vmem>>, %arg11: memref<16x16xbf16, #tpu.memory_space<vmem>>, %arg12: memref<1x16x16xf32, #tpu.memory_space<vmem>>, %arg13: memref<1x16x16xf32, #tpu.memory_space<vmem>>, %arg14: memref<1x1x16x16xf32, #tpu.memory_space<vmem>>, %arg15: memref<1x1x16x16xf32, #tpu.memory_space<vmem>>) attributes {dimension_semantics = [#tpu.dimension_semantics<parallel>, #tpu.dimension_semantics<parallel>], iteration_bounds = array<i64: 3, 2>, scalar_prefetch = 0 : i64, scratch_operands = 0 : i64, tpu.core_type = #tpu.core_type<tc>, window_params = [{transform_indices = @transform_0, window_bounds = array<i64: 1, 1, 16, 16>}, {transform_indices = @transform_1, window_bounds = array<i64: 1, 1, 16, 16>}, {pipeline_mode = #tpu.pipeline_mode<synchronous>, transform_indices = @transform_2, window_bounds = array<i64: 16, 16>}, {pipeline_mode = #tpu.pipeline_mode<synchronous>, transform_indices = @transform_3, window_bounds = array<i64: 16, 16>}, {pipeline_mode = #tpu.pipeline_mode<synchronous>, transform_indices = @transform_4, window_bounds = array<i64: 16, 16>}, {pipeline_mode = #tpu.pipeline_mode<synchronous>, transform_indices = @transform_5, window_bounds = array<i64: 16, 16>}, {pipeline_mode = #tpu.pipeline_mode<synchronous>, transform_indices = @transform_6, window_bounds = array<i64: 16, 16>}, {pipeline_mode = #tpu.pipeline_mode<synchronous>, transform_indices = @transform_7, window_bounds = array<i64: 16, 16>}, {pipeline_mode = #tpu.pipeline_mode<synchronous>, transform_indices = @transform_8, window_bounds = array<i64: 16, 16>}, {pipeline_mode = #tpu.pipeline_mode<synchronous>, transform_indices = @transform_9, window_bounds = array<i64: 16, 16>}, {transform_indices = @transform_10, window_bounds = array<i64: 1, 16, 16>}, {transform_indices = @transform_11, window_bounds = array<i64: 1, 16, 16>}, {transform_indices = @transform_12, window_bounds = array<i64: 1, 1, 16, 16>}, {transform_indices = @transform_13, window_bounds = array<i64: 1, 1, 16, 16>}]} {
    %c0 = arith.constant 0 : index
    %c0_0 = arith.constant 0 : index
    %c0_1 = arith.constant 0 : index
    %c0_2 = arith.constant 0 : index
    %0 = vector.load %arg2[%c0, %c0_0, %c0_1, %c0_2] : memref<1x1x16x16xbf16, #tpu.memory_space<vmem>>, vector<1x1x16x16xbf16>
    %1 = vector.shape_cast %0 : vector<1x1x16x16xbf16> to vector<16x16xbf16>
    %c0_3 = arith.constant 0 : index
    %c0_4 = arith.constant 0 : index
    %c0_5 = arith.constant 0 : index
    %c0_6 = arith.constant 0 : index
    %2 = vector.load %arg3[%c0_3, %c0_4, %c0_5, %c0_6] : memref<1x1x16x16xbf16, #tpu.memory_space<vmem>>, vector<1x1x16x16xbf16>
    %3 = vector.shape_cast %2 : vector<1x1x16x16xbf16> to vector<16x16xbf16>
    %c0_7 = arith.constant 0 : index
    %c0_8 = arith.constant 0 : index
    %4 = vector.load %arg4[%c0_7, %c0_8] : memref<16x16xbf16, #tpu.memory_space<vmem>>, vector<16x16xbf16>
    %c0_9 = arith.constant 0 : index
    %c0_10 = arith.constant 0 : index
    %5 = vector.load %arg5[%c0_9, %c0_10] : memref<16x16xbf16, #tpu.memory_space<vmem>>, vector<16x16xbf16>
    %6 = arith.addf %4, %5 : vector<16x16xbf16>
    %7 = arith.addf %1, %3 : vector<16x16xbf16>
    %cst = arith.constant dense<0.000000e+00> : vector<16x16xf32>
    %8 = tpu.matmul %4, %1, %cst {dimension_numbers = #tpu.dot_dimension_numbers<[1], [0], [0], [1], [0, 0, 1, 1], [], []>} : vector<16x16xbf16>, vector<16x16xbf16>, vector<16x16xf32> -> vector<16x16xf32>
    %cst_11 = arith.constant dense<0.000000e+00> : vector<16x16xf32>
    %9 = tpu.matmul %5, %3, %cst_11 {dimension_numbers = #tpu.dot_dimension_numbers<[1], [0], [0], [1], [0, 0, 1, 1], [], []>} : vector<16x16xbf16>, vector<16x16xbf16>, vector<16x16xf32> -> vector<16x16xf32>
    %cst_12 = arith.constant dense<0.000000e+00> : vector<16x16xf32>
    %10 = tpu.matmul %6, %7, %cst_12 {dimension_numbers = #tpu.dot_dimension_numbers<[1], [0], [0], [1], [0, 0, 1, 1], [], []>} : vector<16x16xbf16>, vector<16x16xbf16>, vector<16x16xf32> -> vector<16x16xf32>
    %11 = arith.subf %8, %9 : vector<16x16xf32>
    %12 = arith.subf %10, %8 : vector<16x16xf32>
    %13 = arith.subf %12, %9 : vector<16x16xf32>
    %c0_13 = arith.constant 0 : index
    %c0_14 = arith.constant 0 : index
    %14 = vector.load %arg6[%c0_13, %c0_14] : memref<16x16xbf16, #tpu.memory_space<vmem>>, vector<16x16xbf16>
    %c0_15 = arith.constant 0 : index
    %c0_16 = arith.constant 0 : index
    %15 = vector.load %arg7[%c0_15, %c0_16] : memref<16x16xbf16, #tpu.memory_space<vmem>>, vector<16x16xbf16>
    %16 = arith.addf %11, %13 : vector<16x16xf32>
    %17 = arith.truncf %16 : vector<16x16xf32> to vector<16x16xbf16>
    %18 = arith.addf %14, %15 : vector<16x16xbf16>
    %19 = arith.truncf %11 : vector<16x16xf32> to vector<16x16xbf16>
    %20 = arith.truncf %13 : vector<16x16xf32> to vector<16x16xbf16>
    %cst_17 = arith.constant dense<0.000000e+00> : vector<16x16xf32>
    %21 = tpu.matmul %19, %14, %cst_17 {dimension_numbers = #tpu.dot_dimension_numbers<[1], [0], [0], [1], [0, 0, 1, 1], [], []>} : vector<16x16xbf16>, vector<16x16xbf16>, vector<16x16xf32> -> vector<16x16xf32>
    %cst_18 = arith.constant dense<0.000000e+00> : vector<16x16xf32>
    %22 = tpu.matmul %20, %15, %cst_18 {dimension_numbers = #tpu.dot_dimension_numbers<[1], [0], [0], [1], [0, 0, 1, 1], [], []>} : vector<16x16xbf16>, vector<16x16xbf16>, vector<16x16xf32> -> vector<16x16xf32>
    %cst_19 = arith.constant dense<0.000000e+00> : vector<16x16xf32>
    %23 = tpu.matmul %17, %18, %cst_19 {dimension_numbers = #tpu.dot_dimension_numbers<[1], [0], [0], [1], [0, 0, 1, 1], [], []>} : vector<16x16xbf16>, vector<16x16xbf16>, vector<16x16xf32> -> vector<16x16xf32>
    %24 = arith.subf %21, %22 : vector<16x16xf32>
    %25 = arith.subf %23, %21 : vector<16x16xf32>
    %26 = arith.subf %25, %22 : vector<16x16xf32>
    %c0_20 = arith.constant 0 : index
    %c0_21 = arith.constant 0 : index
    %c0_22 = arith.constant 0 : index
    %27 = vector.load %arg12[%c0_20, %c0_21, %c0_22] : memref<1x16x16xf32, #tpu.memory_space<vmem>>, vector<1x16x16xf32>
    %28 = vector.shape_cast %27 : vector<1x16x16xf32> to vector<16x16xf32>
    %c0_23 = arith.constant 0 : index
    %c0_24 = arith.constant 0 : index
    %c0_25 = arith.constant 0 : index
    %29 = vector.load %arg13[%c0_23, %c0_24, %c0_25] : memref<1x16x16xf32, #tpu.memory_space<vmem>>, vector<1x16x16xf32>
    %30 = vector.shape_cast %29 : vector<1x16x16xf32> to vector<16x16xf32>
    %31 = arith.mulf %24, %28 : vector<16x16xf32>
    %32 = arith.mulf %26, %30 : vector<16x16xf32>
    %33 = arith.subf %31, %32 : vector<16x16xf32>
    %34 = arith.mulf %24, %30 : vector<16x16xf32>
    %35 = arith.mulf %26, %28 : vector<16x16xf32>
    %36 = arith.addf %34, %35 : vector<16x16xf32>
    %c0_26 = arith.constant 0 : index
    %c0_27 = arith.constant 0 : index
    %37 = vector.load %arg8[%c0_26, %c0_27] : memref<16x16xbf16, #tpu.memory_space<vmem>>, vector<16x16xbf16>
    %c0_28 = arith.constant 0 : index
    %c0_29 = arith.constant 0 : index
    %38 = vector.load %arg9[%c0_28, %c0_29] : memref<16x16xbf16, #tpu.memory_space<vmem>>, vector<16x16xbf16>
    %39 = arith.addf %37, %38 : vector<16x16xbf16>
    %40 = arith.addf %33, %36 : vector<16x16xf32>
    %41 = arith.truncf %40 : vector<16x16xf32> to vector<16x16xbf16>
    %42 = arith.truncf %33 : vector<16x16xf32> to vector<16x16xbf16>
    %43 = arith.truncf %36 : vector<16x16xf32> to vector<16x16xbf16>
    %cst_30 = arith.constant dense<0.000000e+00> : vector<16x16xf32>
    %44 = tpu.matmul %37, %42, %cst_30 {dimension_numbers = #tpu.dot_dimension_numbers<[1], [0], [0], [1], [0, 0, 1, 1], [], []>} : vector<16x16xbf16>, vector<16x16xbf16>, vector<16x16xf32> -> vector<16x16xf32>
    %cst_31 = arith.constant dense<0.000000e+00> : vector<16x16xf32>
    %45 = tpu.matmul %38, %43, %cst_31 {dimension_numbers = #tpu.dot_dimension_numbers<[1], [0], [0], [1], [0, 0, 1, 1], [], []>} : vector<16x16xbf16>, vector<16x16xbf16>, vector<16x16xf32> -> vector<16x16xf32>
    %cst_32 = arith.constant dense<0.000000e+00> : vector<16x16xf32>
    %46 = tpu.matmul %39, %41, %cst_32 {dimension_numbers = #tpu.dot_dimension_numbers<[1], [0], [0], [1], [0, 0, 1, 1], [], []>} : vector<16x16xbf16>, vector<16x16xbf16>, vector<16x16xf32> -> vector<16x16xf32>
    %47 = arith.subf %44, %45 : vector<16x16xf32>
    %48 = arith.subf %46, %44 : vector<16x16xf32>
    %49 = arith.subf %48, %45 : vector<16x16xf32>
    %c0_33 = arith.constant 0 : index
    %c0_34 = arith.constant 0 : index
    %50 = vector.load %arg10[%c0_33, %c0_34] : memref<16x16xbf16, #tpu.memory_space<vmem>>, vector<16x16xbf16>
    %c0_35 = arith.constant 0 : index
    %c0_36 = arith.constant 0 : index
    %51 = vector.load %arg11[%c0_35, %c0_36] : memref<16x16xbf16, #tpu.memory_space<vmem>>, vector<16x16xbf16>
    %52 = arith.addf %47, %49 : vector<16x16xf32>
    %53 = arith.truncf %52 : vector<16x16xf32> to vector<16x16xbf16>
    %54 = arith.addf %50, %51 : vector<16x16xbf16>
    %55 = arith.truncf %47 : vector<16x16xf32> to vector<16x16xbf16>
    %56 = arith.truncf %49 : vector<16x16xf32> to vector<16x16xbf16>
    %cst_37 = arith.constant dense<0.000000e+00> : vector<16x16xf32>
    %57 = tpu.matmul %55, %50, %cst_37 {dimension_numbers = #tpu.dot_dimension_numbers<[1], [0], [0], [1], [0, 0, 1, 1], [], []>} : vector<16x16xbf16>, vector<16x16xbf16>, vector<16x16xf32> -> vector<16x16xf32>
    %cst_38 = arith.constant dense<0.000000e+00> : vector<16x16xf32>
    %58 = tpu.matmul %56, %51, %cst_38 {dimension_numbers = #tpu.dot_dimension_numbers<[1], [0], [0], [1], [0, 0, 1, 1], [], []>} : vector<16x16xbf16>, vector<16x16xbf16>, vector<16x16xf32> -> vector<16x16xf32>
    %cst_39 = arith.constant dense<0.000000e+00> : vector<16x16xf32>
    %59 = tpu.matmul %53, %54, %cst_39 {dimension_numbers = #tpu.dot_dimension_numbers<[1], [0], [0], [1], [0, 0, 1, 1], [], []>} : vector<16x16xbf16>, vector<16x16xbf16>, vector<16x16xf32> -> vector<16x16xf32>
    %60 = arith.subf %57, %58 : vector<16x16xf32>
    %61 = arith.subf %59, %57 : vector<16x16xf32>
    %62 = arith.subf %61, %58 : vector<16x16xf32>
    %63 = arith.mulf %60, %60 : vector<16x16xf32>
    %64 = arith.mulf %62, %62 : vector<16x16xf32>
    %65 = arith.addf %63, %64 : vector<16x16xf32>
    %66 = math.sqrt %65 : vector<16x16xf32>
    %c0_40 = arith.constant 0 : index
    %c0_41 = arith.constant 0 : index
    %c0_42 = arith.constant 0 : index
    %c0_43 = arith.constant 0 : index
    %67 = vector.load %arg14[%c0_40, %c0_41, %c0_42, %c0_43] : memref<1x1x16x16xf32, #tpu.memory_space<vmem>>, vector<1x1x16x16xf32>
    %68 = vector.shape_cast %67 : vector<1x1x16x16xf32> to vector<16x16xf32>
    %69 = vector.shape_cast %66 : vector<16x16xf32> to vector<1x1x16x16xf32>
    tpu.vector_store %arg14[%c0_40, %c0_41, %c0_42, %c0_43], %69 {strides = array<i32>} : memref<1x1x16x16xf32, #tpu.memory_space<vmem>>, vector<1x1x16x16xf32>,
    %70 = math.absf %60 : vector<16x16xf32>
    %71 = math.absf %62 : vector<16x16xf32>
    %72 = arith.maximumf %70, %71 : vector<16x16xf32>
    %73 = arith.minimumf %70, %71 : vector<16x16xf32>
    %cst_44 = arith.constant 1.000000e-30 : f32
    %74 = vector.broadcast %cst_44 : f32 to vector<16x16xf32>
    %75 = arith.maximumf %72, %74 : vector<16x16xf32>
    %76 = arith.divf %73, %75 : vector<16x16xf32>
    %77 = arith.mulf %76, %76 : vector<16x16xf32>
    %cst_45 = arith.constant 1.000000e+00 : f32
    %78 = vector.broadcast %cst_45 : f32 to vector<16x16xf32>
    %79 = arith.addf %78, %77 : vector<16x16xf32>
    %80 = math.sqrt %79 : vector<16x16xf32>
    %cst_46 = arith.constant 1.000000e+00 : f32
    %81 = vector.broadcast %cst_46 : f32 to vector<16x16xf32>
    %82 = arith.addf %81, %80 : vector<16x16xf32>
    %83 = arith.divf %76, %82 : vector<16x16xf32>
    %84 = arith.mulf %83, %83 : vector<16x16xf32>
    %cst_47 = arith.constant 1.000000e+00 : f32
    %85 = vector.broadcast %cst_47 : f32 to vector<16x16xf32>
    %86 = arith.addf %85, %84 : vector<16x16xf32>
    %87 = math.sqrt %86 : vector<16x16xf32>
    %cst_48 = arith.constant 1.000000e+00 : f32
    %88 = vector.broadcast %cst_48 : f32 to vector<16x16xf32>
    %89 = arith.addf %88, %87 : vector<16x16xf32>
    %90 = arith.divf %83, %89 : vector<16x16xf32>
    %91 = arith.mulf %90, %90 : vector<16x16xf32>
    %cst_49 = arith.constant 0.111111112 : f32
    %92 = vector.broadcast %cst_49 : f32 to vector<16x16xf32>
    %93 = arith.mulf %91, %92 : vector<16x16xf32>
    %cst_50 = arith.constant -0.142857149 : f32
    %94 = vector.broadcast %cst_50 : f32 to vector<16x16xf32>
    %95 = arith.addf %94, %93 : vector<16x16xf32>
    %96 = arith.mulf %91, %95 : vector<16x16xf32>
    %cst_51 = arith.constant 2.000000e-01 : f32
    %97 = vector.broadcast %cst_51 : f32 to vector<16x16xf32>
    %98 = arith.addf %97, %96 : vector<16x16xf32>
    %99 = arith.mulf %91, %98 : vector<16x16xf32>
    %cst_52 = arith.constant -0.333333343 : f32
    %100 = vector.broadcast %cst_52 : f32 to vector<16x16xf32>
    %101 = arith.addf %100, %99 : vector<16x16xf32>
    %102 = arith.mulf %91, %101 : vector<16x16xf32>
    %cst_53 = arith.constant 1.000000e+00 : f32
    %103 = vector.broadcast %cst_53 : f32 to vector<16x16xf32>
    %104 = arith.addf %103, %102 : vector<16x16xf32>
    %105 = arith.mulf %90, %104 : vector<16x16xf32>
    %cst_54 = arith.constant 4.000000e+00 : f32
    %106 = vector.broadcast %cst_54 : f32 to vector<16x16xf32>
    %107 = arith.mulf %106, %105 : vector<16x16xf32>
    %108 = arith.cmpf ogt, %71, %70 : vector<16x16xf32>
    %cst_55 = arith.constant 1.57079637 : f32
    %109 = vector.broadcast %cst_55 : f32 to vector<16x16xf32>
    %110 = arith.subf %109, %107 : vector<16x16xf32>
    %111 = arith.select %108, %110, %107 : vector<16x16xi1>, vector<16x16xf32>
    %cst_56 = arith.constant 0.000000e+00 : f32
    %112 = vector.broadcast %cst_56 : f32 to vector<16x16xf32>
    %113 = arith.cmpf olt, %60, %112 : vector<16x16xf32>
    %cst_57 = arith.constant 3.14159274 : f32
    %114 = vector.broadcast %cst_57 : f32 to vector<16x16xf32>
    %115 = arith.subf %114, %111 : vector<16x16xf32>
    %116 = arith.select %113, %115, %111 : vector<16x16xi1>, vector<16x16xf32>
    %cst_58 = arith.constant 0.000000e+00 : f32
    %117 = vector.broadcast %cst_58 : f32 to vector<16x16xf32>
    %118 = arith.cmpf olt, %62, %117 : vector<16x16xf32>
    %cst_59 = arith.constant 0.000000e+00 : f32
    %119 = vector.broadcast %cst_59 : f32 to vector<16x16xf32>
    %120 = arith.subf %119, %116 : vector<16x16xf32>
    %121 = arith.select %118, %120, %116 : vector<16x16xi1>, vector<16x16xf32>
    %c0_60 = arith.constant 0 : index
    %c0_61 = arith.constant 0 : index
    %c0_62 = arith.constant 0 : index
    %c0_63 = arith.constant 0 : index
    %122 = vector.load %arg15[%c0_60, %c0_61, %c0_62, %c0_63] : memref<1x1x16x16xf32, #tpu.memory_space<vmem>>, vector<1x1x16x16xf32>
    %123 = vector.shape_cast %122 : vector<1x1x16x16xf32> to vector<16x16xf32>
    %124 = vector.shape_cast %121 : vector<16x16xf32> to vector<1x1x16x16xf32>
    tpu.vector_store %arg15[%c0_60, %c0_61, %c0_62, %c0_63], %124 {strides = array<i32>} : memref<1x1x16x16xf32, #tpu.memory_space<vmem>>, vector<1x1x16x16xf32>,
    return
  }
  func.func @transform_0(%arg0: i32, %arg1: i32) -> (i32, i32, i32, i32) {
    %c0_i32 = arith.constant 0 : i32
    %c0_i32_0 = arith.constant 0 : i32
    %c0_i32_1 = arith.constant 0 : i32
    return %arg0, %arg1, %c0_i32, %c0_i32_0 : i32, i32, i32, i32
  }
  func.func @transform_1(%arg0: i32, %arg1: i32) -> (i32, i32, i32, i32) {
    %c0_i32 = arith.constant 0 : i32
    %c0_i32_0 = arith.constant 0 : i32
    %c0_i32_1 = arith.constant 0 : i32
    return %arg0, %arg1, %c0_i32, %c0_i32_0 : i32, i32, i32, i32
  }
  func.func @transform_2(%arg0: i32, %arg1: i32) -> (i32, i32) {
    %c0_i32 = arith.constant 0 : i32
    %c0_i32_0 = arith.constant 0 : i32
    %c0_i32_1 = arith.constant 0 : i32
    return %c0_i32, %c0_i32_0 : i32, i32
  }
  func.func @transform_3(%arg0: i32, %arg1: i32) -> (i32, i32) {
    %c0_i32 = arith.constant 0 : i32
    %c0_i32_0 = arith.constant 0 : i32
    %c0_i32_1 = arith.constant 0 : i32
    return %c0_i32, %c0_i32_0 : i32, i32
  }
  func.func @transform_4(%arg0: i32, %arg1: i32) -> (i32, i32) {
    %c0_i32 = arith.constant 0 : i32
    %c0_i32_0 = arith.constant 0 : i32
    %c0_i32_1 = arith.constant 0 : i32
    return %c0_i32, %c0_i32_0 : i32, i32
  }
  func.func @transform_5(%arg0: i32, %arg1: i32) -> (i32, i32) {
    %c0_i32 = arith.constant 0 : i32
    %c0_i32_0 = arith.constant 0 : i32
    %c0_i32_1 = arith.constant 0 : i32
    return %c0_i32, %c0_i32_0 : i32, i32
  }
  func.func @transform_6(%arg0: i32, %arg1: i32) -> (i32, i32) {
    %c0_i32 = arith.constant 0 : i32
    %c0_i32_0 = arith.constant 0 : i32
    %c0_i32_1 = arith.constant 0 : i32
    return %c0_i32, %c0_i32_0 : i32, i32
  }
  func.func @transform_7(%arg0: i32, %arg1: i32) -> (i32, i32) {
    %c0_i32 = arith.constant 0 : i32
    %c0_i32_0 = arith.constant 0 : i32
    %c0_i32_1 = arith.constant 0 : i32
    return %c0_i32, %c0_i32_0 : i32, i32
  }
  func.func @transform_8(%arg0: i32, %arg1: i32) -> (i32, i32) {
    %c0_i32 = arith.constant 0 : i32
    %c0_i32_0 = arith.constant 0 : i32
    %c0_i32_1 = arith.constant 0 : i32
    return %c0_i32, %c0_i32_0 : i32, i32
  }
  func.func @transform_9(%arg0: i32, %arg1: i32) -> (i32, i32) {
    %c0_i32 = arith.constant 0 : i32
    %c0_i32_0 = arith.constant 0 : i32
    %c0_i32_1 = arith.constant 0 : i32
    return %c0_i32, %c0_i32_0 : i32, i32
  }
  func.func @transform_10(%arg0: i32, %arg1: i32) -> (i32, i32, i32) {
    %c0_i32 = arith.constant 0 : i32
    %c0_i32_0 = arith.constant 0 : i32
    %c0_i32_1 = arith.constant 0 : i32
    return %arg0, %c0_i32, %c0_i32_0 : i32, i32, i32
  }
  func.func @transform_11(%arg0: i32, %arg1: i32) -> (i32, i32, i32) {
    %c0_i32 = arith.constant 0 : i32
    %c0_i32_0 = arith.constant 0 : i32
    %c0_i32_1 = arith.constant 0 : i32
    return %arg0, %c0_i32, %c0_i32_0 : i32, i32, i32
  }
  func.func @transform_12(%arg0: i32, %arg1: i32) -> (i32, i32, i32, i32) {
    %c0_i32 = arith.constant 0 : i32
    %c0_i32_0 = arith.constant 0 : i32
    %c0_i32_1 = arith.constant 0 : i32
    return %arg0, %arg1, %c0_i32, %c0_i32_0 : i32, i32, i32, i32
  }
  func.func @transform_13(%arg0: i32, %arg1: i32) -> (i32, i32, i32, i32) {
    %c0_i32 = arith.constant 0 : i32
    %c0_i32_0 = arith.constant 0 : i32
    %c0_i32_1 = arith.constant 0 : i32
    return %arg0, %arg1, %c0_i32, %c0_i32_0 : i32, i32, i32, i32
  }
}

</mosaic_0001>

<bundles_post_ra>
// kernel: tpu_custom_call.1
= control target key start
LH: loop header
LB: loop body
LE: loop exit
PB: predicated region body
PF: predicated region fallthrough
CT: control target
= control target key end

     0   :  { %s3314_s0 = inlined_call_operand.hbm [shape: bf16[3,2,16,16], index: 0, kind: input, shape index: {}]   ;;  %s3315_s1 = inlined_call_operand.hbm [shape: bf16[3,2,16,16], index: 1, kind: input, shape index: {}]   ;;  %s3316_s2 = inlined_call_operand.hbm [shape: bf16[16,16], index: 2, kind: input, shape index: {}]   ;;  %s3317_s3 = inlined_call_operand.hbm [shape: bf16[16,16], index: 3, kind: input, shape index: {}]   ;;  %s3318_s4 = inlined_call_operand.hbm [shape: bf16[16,16], index: 4, kind: input, shape index: {}]   ;;  %s3319_s5 = inlined_call_operand.vmem [shape: bf16[16,16], index: 5, kind: input, shape index: {}]   ;;  %s3320_s6 = inlined_call_operand.hbm [shape: bf16[16,16], index: 6, kind: input, shape index: {}]   ;;  %s3321_s7 = inlined_call_operand.hbm [shape: bf16[16,16], index: 7, kind: input, shape index: {}]   ;;  %s3322_s8 = inlined_call_operand.hbm [shape: bf16[16,16], index: 8, kind: input, shape index: {}]   ;;  %s3323_s9 = inlined_call_operand.vmem [shape: bf16[16,16], index: 9, kind: input, shape index: {}]   ;;  %s3324_s10 = inlined_call_operand.hbm [shape: f32[3,16,16], index: 10, kind: input, shape index: {}]   ;;  %s3325_s11 = inlined_call_operand.hbm [shape: f32[3,16,16], index: 11, kind: input, shape index: {}]   ;;  %s3326_s12 = inlined_call_operand.hbm [shape: f32[3,2,16,16], index: 12, kind: output, shape index: {0}]   ;;  %s3327_s13 = inlined_call_operand.hbm [shape: f32[3,2,16,16], index: 13, kind: output, shape index: {1}]  }
   0x1   :  { %3351 = sst [smem:[#allocation44_spill]] %s3314_s0 }
   0x2   :  { %3352 = sst [smem:[#allocation45_spill]] %s3316_s2 }
   0x3   :  { %3353 = sst [smem:[#allocation46_spill]] %s3317_s3 }
   0x4   :  { %3354 = sst [smem:[#allocation47_spill]] %s3319_s5 }
   0x5   :  { %3355 = sst [smem:[#allocation48_spill]] %s3320_s6 }
   0x6   :  { %3356 = sst [smem:[#allocation49_spill]] %s3323_s9 }
   0x7   :  { %3357 = sst [smem:[#allocation50_spill]] %s3324_s10 }
   0x8   :  { %3358 = sst [smem:[#allocation51_spill]] %s3325_s11 }
   0x9   :  { %3359 = sst [smem:[#allocation52_spill]] %s3326_s12 }
   0xa   :  { %3360 = sst [smem:[#allocation53_spill]] %s3327_s13 }
   0xb   :  { %19 = vsyncpa [#allocation3], 0 }
   0xc   :  { %21 = vsyncpa [#allocation3 + $0x1], 0 }
   0xd   :  { %22 = vsyncpa [#allocation6], 0 }
   0xe   :  { %24 = vsyncpa [#allocation6 + $0x1], 0 }
   0xf   :  { %25 = vsyncpa [#allocation9], 0 }
  0x10   :  { %26 = vsyncpa [#allocation12], 0 }
  0x11   :  { %27 = vsyncpa [#allocation15], 0 }
  0x12   :  { %28 = vsyncpa [#allocation4], 0 }
  0x13   :  { %30 = vsyncpa [#allocation4 + $0x1], 0 }
  0x14   :  { %31 = vsyncpa [#allocation20], 0 }
  0x15   :  { %33 = vsyncpa [#allocation20 + $0x1], 0  ;;  %s2742_s25 = smov 0   ;;  %s2744_s26 = smov 0  }
  0x16   :  { %s2746_s27 = smov 0   ;;  %s2748_s28 = smov 0  }
  0x17   :  { %s2750_s29 = smov 0   ;;  %s2752_s30 = smov 0  }
  0x18   :  { %s2754_s14 = smov 0   ;;  %s2756_s15 = smov 0  }
  0x19   :  { %s2758_s16 = smov 0   ;;  %s2760_s17 = smov 0  }
  0x1a   :  { %s2762_s18 = smov 0  }
  0x1b LB: > { %3361 = sst [smem:[#allocation31_spill]] %s2622_s28  ;;  %s2798_s19 = sadd.s32 4294967295, %s2650_s18   ;;  %s2650_s18 = sphi %s2762_s18, %s39_s18   ;;  %s2646_s17 = sphi %s2760_s17, %s3431_s17   ;;  %s2642_s16 = sphi %s2758_s16, %s3425_s16   ;;  %s2638_s15 = sphi %s2756_s15, %s3430_s15   ;;  %s2634_s14 = sphi %s2754_s14, %s3424_s14   ;;  %s2630_s30 = sphi %s2752_s30, %s3423_s30   ;;  %s2626_s29 = sphi %s2750_s29, %s3422_s29   ;;  %s2622_s28 = sphi %s2748_s28, %s3421_s28   ;;  %s2618_s27 = sphi %s2746_s27, %s3429_s27   ;;  %s2614_s26 = sphi %s2744_s26, %s3428_s26   ;;  %s2610_s25 = sphi %s2742_s25, %s3427_s25  }
  0x1c   : > { %3362 = sst [smem:[#allocation32_spill]] %s2626_s29  ;;  %p1809_p0 = scmp.ge.s32.totalorder %s2650_s18, 1 }
  0x1d   : > { %3363 = sst [smem:[#allocation33_spill]] %s2630_s30  ;;  %p3337_p1 = scmp.eq.s32.totalorder %s2798_s19, 0 }
  0x1e   : > { %3364 = sst [smem:[#allocation34_spill]] %s2634_s14  ;;  %p388_p2 = scmp.lt.s32.totalorder %s2650_s18, 7 }
  0x1f   : > { %3365 = sst [smem:[#allocation35_spill]] %s2638_s15  ;;  %s2652_s21 = smov [#allocation7]  }
  0x20   : > { %3366 = sst [smem:[#allocation36_spill]] %s2642_s16  ;;  %p2803_p3 = pnand %p1809_p0, %p388_p2 }
  0x21   : > { %s400_s22 = sshll.u32 %s2652_s21, 4  ;;  %s2653_s24 = smov [#allocation8]   ;;  %s401_s22 = int_to_ptr.vmem [resolvable:$true] %s400_s22 }
  0x22   : > { %s3367_s20 = scalar_select %p2803_p3, 1, 0 }
  0x23   : > { %p2015_p4 = pneg %p2803_p3  ;;  %s413_s13 = sshll.u32 %s2653_s24, 4  ;;  %s414_s13 = int_to_ptr.vmem [resolvable:$true] %s413_s13 }
  0x24   : > { %3368 = sst [smem:[#allocation37_spill]] %s3367_s20  ;;  %s2654_s12 = smov [#allocation11]  }
  0x25   : > { %p2811_p5 = pnand %p2015_p4, %p3337_p1  ;;  %s442_s15 = sshll.u32 %s2654_s12, 4  ;;  %s443_s15 = int_to_ptr.vmem [resolvable:$true] %s442_s15 }
  0x26   : > { %s2215_s21 = scalar_lea.vmem %s401_s22, 128  ;;  %p2223_p10 = scmp.lt.s32.totalorder %s401_s22, %s401_s22 }
  0x27   : > { %p2817_p6 = pneg %p2811_p5  ;;  %p2216_p7 = scmp.ne.s32.totalorder %s401_s22, %s2215_s21 }
  0x28   : > { %p2224_p11 = scmp.lt.s32.totalorder %s2215_s21, %s2215_s21 }
  0x29   : > { %p2218_p8 = pnand %p2216_p7, %p2817_p6 }
  0x2a   : > { %p2225_p12 = por %p2224_p11, %p2223_p10 }
  0x2b   : > { %p2219_p9 = pneg %p2218_p8 }
  0x2d   : > { %p2226_p13 = pnand %p2225_p12, %p2219_p9 }
  0x2f   : > { %2229 = shalt.err (!%p2226_p13)
}
  0x30   : > { %s3333_s24 = smov 64   ;;  %s3335_s12 = smov 4  }
  0x31   : > { %s3371_s2 = sld [smem:[#allocation45_spill]]  ;;  %s2241_s20 = scalar_lea.vmem %s414_s13, 128 }
  0x32   : > { %p2242_p0 = scmp.ne.s32.totalorder %s414_s13, %s2241_s20  ;;  %p2249_p7 = scmp.lt.s32.totalorder %s414_s13, %s414_s13 }
  0x33   : > { %p2250_p8 = scmp.lt.s32.totalorder %s2241_s20, %s2241_s20 }
  0x34   : > { %p2244_p2 = pnand %p2242_p0, %p2817_p6 }
  0x35   : > { %p2251_p9 = por %p2250_p8, %p2249_p7 }
  0x36   : > { %p2245_p4 = pneg %p2244_p2 }
  0x37   : > { %2018 = dma.hbm_to_vmem [thread:$0]  (!%p2811_p5), %s3371_s2, 128, %s401_s22, [#allocation6], %s3333_s24, %s3333_s24, %s3335_s12  }
  0x38   : > { %p2252_p10 = pnand %p2251_p9, %p2245_p4 }
  0x3a   : > { %2255 = shalt.err (!%p2252_p10)
}
  0x3b   : > { %s3372_s3 = sld [smem:[#allocation46_spill]]  ;;  %s2267_s5 = scalar_lea.vmem %s443_s15, 128 }
  0x3c   : > { %p2268_p11 = scmp.ne.s32.totalorder %s443_s15, %s2267_s5  ;;  %p2275_p0 = scmp.lt.s32.totalorder %s443_s15, %s443_s15 }
  0x3d   : > { %p2276_p2 = scmp.lt.s32.totalorder %s2267_s5, %s2267_s5 }
  0x3e   : > { %p2270_p12 = pnand %p2268_p11, %p2817_p6 }
  0x3f   : > { %p2277_p4 = por %p2276_p2, %p2275_p0 }
  0x40   : > { %p2271_p13 = pneg %p2270_p12 }
  0x41   : > { %2021 = dma.hbm_to_vmem [thread:$0]  (!%p2811_p5), %s3372_s3, 128, %s414_s13, [#allocation9], %s3333_s24, %s3333_s24, %s3335_s12  }
  0x42   : > { %p2278_p7 = pnand %p2277_p4, %p2271_p13 }
  0x44   : > { %2281 = shalt.err (!%p2278_p7)
}
  0x45   : > { %s3373_s6 = sld [smem:[#allocation48_spill]]  ;;  %s1808_s13 = sadd.s32 4294967294, %s2650_s18  }
  0x46   : > { %s48_s20 = sadd.s32 1, %s2642_s16  ;;  %s51_s22 = sadd.s32 1, %s2646_s17 }
  0x47   : > { %p49_p8 = scmp.ge.s32.totalorder %s48_s20, 2  ;;  %s60_s21 = sadd.s32 1, %s2630_s30 }
  0x48   : > { %p67_p9 = scmp.ne.s32.totalorder %s2630_s30, %s2626_s29  ;;  %p3338_p10 = scmp.eq.s32.totalorder %s2650_s18, 0 }
  0x49   : > { %s3433_s20 = smov (%p49_p8, %s48_s20), 0  ;;  %s3435_s22 = smov (!%p49_p8, %s51_s22), %s2646_s17 }
  0x4a   : > { %3374 = sst [smem:[#allocation38_spill]] %s3433_s20  ;;  %s56_s5 = ssub.s32 %s2642_s16, %s3433_s20 }
  0x4b   : > { %2027 = dma.hbm_to_vmem [thread:$0]  (!%p2811_p5), %s3373_s6, 128, %s443_s15, [#allocation12], %s3333_s24, %s3333_s24, %s3335_s12  }
  0x4c   : > { %p2865_p11 = por %p3338_p10, %p67_p9  ;;  %p53_p12 = scmp.ge.s32.totalorder %s3435_s22, 3 }
  0x4d   : > { %p73_p13 = scmp.ne.s32.totalorder %s2626_s29, %s2622_s28  ;;  %p347_p0 = scmp.eq.s32.totalorder %s2798_s19, 5 }
  0x4e   : > { %p353_p2 = scmp.eq.s32.totalorder %s1808_s13, 5  ;;  %s3437_s22 = smov (%p53_p12, %s3435_s22), 0 }
  0x4f   : > { %3376 = sst [smem:[#allocation39_spill]] %s3437_s22  ;;  %p2876_p4 = por %p3337_p1, %p73_p13 }
  0x50   : > { %p2880_p7 = por %p347_p0, %p67_p9  ;;  %s2886_s24 = ssub.s32 %s2646_s17, %s3437_s22 }
  0x51   : > { %s3377_s9 = scalar_select %p2876_p4, 1, 0 }
  0x52   : > { %s3379_s11 = scalar_select %p2880_p7, 1, 0 }
  0x53   : > { %3378 = sst [smem:[#allocation40_spill]] %s3377_s9  ;;  %p2888_p8 = por %p353_p2, %p73_p13 }
  0x54   : > { %3380 = sst [smem:[#allocation41_spill]] %s3379_s11  ;;  %s57_s13 = sor.u32 %s56_s5, %s2886_s24 }
  0x55   : > { %s3381_s12 = scalar_select %p2888_p8, 1, 0 }
  0x56   : > { %p58_p1 = scmp.eq.s32.totalorder %s57_s13, 0  ;;  %p3349_p10 = scmp.lt.s32.totalorder %s2650_s18, 6 }
  0x57   : > { %3382 = sst [smem:[#allocation42_spill]] %s3381_s12  ;;  %s487_s3 = sand.u32 1, %s2630_s30  }
  0x58   : > { %s2898_s6 = scalar_select %p58_p1, %s2630_s30, %s60_s21  }
  0x59   : > { %s2900_s20 = sshll.u32 %s487_s3, 3  ;;  %s1818_s22 = sshll.u32 %s2642_s16, 1 }
  0x5a   : > { %3383 = sst [smem:[#allocation43_spill]] %s2898_s6  ;;  %s1819_s28 = sshll.u32 %s2646_s17, 2 }
  0x5b   : > { %s489_s11 = scalar_lea.vmem [#allocation2], %s2900_s20  ;;  %s495_s29 = sadd.s32 %s1819_s28, %s1818_s22 }
  0x5c   : > { %s498_s9 = sshll.u32 %s489_s11, 4  ;;  %s1820_s12 = sshll.u32 %s495_s29, 6  ;;  %s499_s9 = int_to_ptr.vmem [resolvable:$true] %s498_s9 }
  0x5d   : > { %p2909_p9 = pnand %p3349_p10, %p2865_p11  ;;  %s3385_s0 = sld [smem:[#allocation44_spill]] }
  0x5e   : > { %s3386_s21 = sand.u32 1, %s2650_s18   ;;  %s2295_s28 = scalar_lea.vmem %s499_s9, 128 }
  0x5f   : > { %s2918_s16 = scalar_lea.sflag [#allocation3], %s3386_s21  ;;  %p2284_p1 = pneg %p2909_p9 }
  0x60   : > { %p2296_p13 = scmp.ne.s32.totalorder %s499_s9, %s2295_s28  ;;  %s2657_s29 = smov [#allocation2]  }
  0x61   : > { %s2300_s22 = sshll.u32 %s2657_s29, 4  ;;  %s2301_s22 = int_to_ptr.vmem [resolvable:$false] %s2300_s22 }
  0x62   : > { %p2298_p0 = pnand %p2296_p13, %p2284_p1  ;;  %s2302_s15 = scalar_lea.vmem %s2301_s22, 256 }
  0x63   : > { %s497_s3 = scalar_lea.hbm %s3385_s0, %s1820_s12  ;;  %p2303_p2 = scmp.lt.s32.totalorder %s499_s9, %s2301_s22 }
  0x64   : > { %p2299_p11 = pneg %p2298_p0  ;;  %p2304_p10 = scmp.lt.s32.totalorder %s2302_s15, %s2295_s28 }
  0x66   : > { %p2305_p12 = por %p2304_p10, %p2303_p2 }
  0x68   : > { %p2306_p8 = pnand %p2305_p12, %p2299_p11 }
  0x6a   : > { %2309 = shalt.err (!%p2306_p8)
}
  0x6b   : > { %s3387_s2 = smov 4   ;;  %s3388_s11 = smov 64  }
  0x6c   : > { %2037 = dma.hbm_to_vmem [thread:$0]  (!%p2909_p9), %s497_s3, 128, %s499_s9, %s2918_s16, %s3388_s11, %s3388_s11, %s3387_s2  }
  0x6d   : > { %s520_s29 = scalar_lea.hbm %s3315_s1, %s1820_s12  ;;  %s512_s0 = scalar_lea.vmem [#allocation5], %s2900_s20 }
  0x6e   : > { %s521_s22 = sshll.u32 %s512_s0, 4  ;;  %s3389_s28 = sand.u32 1, %s2650_s18   ;;  %s522_s22 = int_to_ptr.vmem [resolvable:$true] %s521_s22 }
  0x6f   : > { %s2937_s15 = scalar_lea.sflag [#allocation6], %s3389_s28  ;;  %s2323_s6 = scalar_lea.vmem %s522_s22, 128 }
  0x70   : > { %p2324_p10 = scmp.ne.s32.totalorder %s522_s22, %s2323_s6  ;;  %s2658_s30 = smov [#allocation5]  }
  0x71   : > { %s2328_s10 = sshll.u32 %s2658_s30, 4  ;;  %s2329_s10 = int_to_ptr.vmem [resolvable:$false] %s2328_s10 }
  0x72   : > { %p2326_p8 = pnand %p2324_p10, %p2284_p1  ;;  %s2330_s9 = scalar_lea.vmem %s2329_s10, 256 }
  0x73   : > { %p2331_p13 = scmp.lt.s32.totalorder %s522_s22, %s2329_s10  ;;  %p2332_p0 = scmp.lt.s32.totalorder %s2330_s9, %s2323_s6 }
  0x74   : > { %p2327_p12 = pneg %p2326_p8 }
  0x75   : > { %p2333_p11 = por %p2332_p0, %p2331_p13 }
  0x77   : > { %p2334_p2 = pnand %p2333_p11, %p2327_p12 }
  0x79   : > { %2337 = shalt.err (!%p2334_p2)
}
  0x7a   : > { %2040 = dma.hbm_to_vmem [thread:$0]  (!%p2909_p9), %s520_s29, 128, %s522_s22, %s2937_s15, %s3388_s11, %s3388_s11, %s3387_s2  }
  0x7b   : > { %s2659_s0 = smov [#allocation10]   ;;  %s2660_s20 = smov [#allocation13]  }
  0x7c   : > { %s426_s12 = sshll.u32 %s2659_s0, 4  ;;  %s455_s30 = sshll.u32 %s2660_s20, 4  ;;  %s427_s12 = int_to_ptr.vmem [resolvable:$true] %s426_s12  ;;  %s456_s30 = int_to_ptr.vmem [resolvable:$true] %s455_s30 }
  0x7d   : > { %s2349_s3 = scalar_lea.vmem %s427_s12, 128  ;;  %p2357_p12 = scmp.lt.s32.totalorder %s427_s12, %s427_s12 }
  0x7e   : > { %p2350_p1 = scmp.ne.s32.totalorder %s427_s12, %s2349_s3  ;;  %p2358_p13 = scmp.lt.s32.totalorder %s2349_s3, %s2349_s3 }
  0x80   : > { %p2352_p10 = pnand %p2350_p1, %p2817_p6  ;;  %p2359_p0 = por %p2358_p13, %p2357_p12 }
  0x82   : > { %p2353_p8 = pneg %p2352_p10 }
  0x84   : > { %p2360_p11 = pnand %p2359_p0, %p2353_p8 }
  0x86   : > { %2363 = shalt.err (!%p2360_p11)
}
  0x87   : > { %2024 = dma.hbm_to_vmem [thread:$0]  (!%p2811_p5), %s3318_s4, 128, %s427_s12, [#allocation9], %s3388_s11, %s3388_s11, %s3387_s2  }
  0x88   : > { %s2375_s5 = scalar_lea.vmem %s456_s30, 128  ;;  %p2383_p10 = scmp.lt.s32.totalorder %s456_s30, %s456_s30 }
  0x89   : > { %p2376_p9 = scmp.ne.s32.totalorder %s456_s30, %s2375_s5  ;;  %p2384_p12 = scmp.lt.s32.totalorder %s2375_s5, %s2375_s5 }
  0x8b   : > { %p2378_p2 = pnand %p2376_p9, %p2817_p6  ;;  %p2385_p8 = por %p2384_p12, %p2383_p10 }
  0x8d   : > { %p2379_p1 = pneg %p2378_p2 }
  0x8f   : > { %p2386_p13 = pnand %p2385_p8, %p2379_p1 }
  0x91   : > { %2389 = shalt.err (!%p2386_p13)
}
  0x92   : > { %2030 = dma.hbm_to_vmem [thread:$0]  (!%p2811_p5), %s3321_s7, 128, %s456_s30, [#allocation12], %s3388_s11, %s3388_s11, %s3387_s2  }
  0x93   : > { %s2661_s29 = smov [#allocation14]  }
  0x94   : > { %s468_s22 = sshll.u32 %s2661_s29, 4  ;;  %s469_s22 = int_to_ptr.vmem [resolvable:$true] %s468_s22 }
  0x95   : > { %s2401_s28 = scalar_lea.vmem %s469_s22, 128  ;;  %p2409_p2 = scmp.lt.s32.totalorder %s469_s22, %s469_s22 }
  0x96   : > { %p2402_p0 = scmp.ne.s32.totalorder %s469_s22, %s2401_s28  ;;  %p2410_p1 = scmp.lt.s32.totalorder %s2401_s28, %s2401_s28 }
  0x98   : > { %p2404_p11 = pnand %p2402_p0, %p2817_p6  ;;  %p2411_p10 = por %p2410_p1, %p2409_p2 }
  0x9a   : > { %p2405_p9 = pneg %p2404_p11 }
  0x9c   : > { %p2412_p12 = pnand %p2411_p10, %p2405_p9 }
  0x9e   : > { %2415 = shalt.err (!%p2412_p12)
}
  0x9f   : > { %2033 = dma.hbm_to_vmem [thread:$0]  (!%p2811_p5), %s3322_s8, 128, %s469_s22, [#allocation15], %s3388_s11, %s3388_s11, %s3387_s2  }
  0xa0   : > { %s282_s14 = sadd.s32 1, %s2618_s27  ;;  %p289_p6 = scmp.ne.s32.totalorder %s2618_s27, %s2614_s26 }
  0xa1   : > { %p3390_p8 = scmp.eq.s32.totalorder %s2886_s24, 0  ;;  %p3391_p13 = scmp.eq.s32.totalorder %s2650_s18, 0 }
  0xa2   : > { %p295_p11 = scmp.ne.s32.totalorder %s2614_s26, %s2610_s25  ;;  %s533_s12 = sand.u32 1, %s2618_s27  }
  0xa3   : > { %s2984_s23 = scalar_select %p3390_p8, %s2618_s27, %s282_s14  }
  0xa4   : > { %p291_p0 = por %p289_p6, %p3391_p13  ;;  %s1881_s20 = sshll.u32 %s2646_s17, 8 }
  0xa5   : > { %p3392_p9 = scmp.eq.s32.totalorder %s2798_s19, 0  ;;  %s1825_s3 = sshll.u32 %s533_s12, 4 }
  0xa6   : > { %s3394_s2 = sld [smem:[#allocation50_spill]]  ;;  %s535_s5 = scalar_lea.vmem [#allocation16], %s1825_s3 }
  0xa7   : > { %p2994_p2 = por %p295_p11, %p3392_p9  ;;  %s542_s24 = sshll.u32 %s535_s5, 4  ;;  %s543_s24 = int_to_ptr.vmem [resolvable:$true] %s542_s24 }
  0xa8   : > { %p3395_p5 = scmp.lt.s32.totalorder %s2650_s18, 6  ;;  %s2429_s25 = scalar_lea.vmem %s543_s24, 256 }
  0xa9   : > { %p2430_p12 = scmp.ne.s32.totalorder %s543_s24, %s2429_s25  ;;  %s2662_s21 = smov [#allocation16]  }
  0xaa   : > { %p3005_p1 = pnand %p3395_p5, %p291_p0  ;;  %s2434_s29 = sshll.u32 %s2662_s21, 4  ;;  %s2435_s29 = int_to_ptr.vmem [resolvable:$false] %s2434_s29 }
  0xab   : > { %s2436_s22 = scalar_lea.vmem %s2435_s29, 512  ;;  %p2437_p13 = scmp.lt.s32.totalorder %s543_s24, %s2435_s29 }
  0xac   : > { %s541_s11 = scalar_lea.hbm %s3394_s2, %s1881_s20  ;;  %p2418_p10 = pneg %p3005_p1 }
  0xad   : > { %p2438_p0 = scmp.lt.s32.totalorder %s2436_s22, %s2429_s25 }
  0xae   : > { %p2432_p6 = pnand %p2430_p12, %p2418_p10 }
  0xaf   : > { %p2439_p11 = por %p2438_p0, %p2437_p13 }
  0xb0   : > { %p2433_p8 = pneg %p2432_p6 }
  0xb2   : > { %p2440_p9 = pnand %p2439_p11, %p2433_p8 }
  0xb4   : > { %2443 = shalt.err (!%p2440_p9)
}
  0xb5   : > { %s2663_s28 = smov 128   ;;  %s2664_s9 = smov 8  }
  0xb6   : > { %2043 = dma.hbm_to_vmem [thread:$0]  (!%p3005_p1), %s541_s11, 256, %s543_s24, %s2918_s16, %s2663_s28, %s2663_s28, %s2664_s9  }
  0xb7   : > { %s3397_s12 = sld [smem:[#allocation51_spill]]  ;;  %s556_s10 = scalar_lea.vmem [#allocation17], %s1825_s3 }
  0xb8   : > { %s563_s2 = sshll.u32 %s556_s10, 4  ;;  %s2665_s25 = smov [#allocation17]   ;;  %s564_s2 = int_to_ptr.vmem [resolvable:$true] %s563_s2 }
  0xb9   : > { %s2457_s5 = scalar_lea.vmem %s564_s2, 256  ;;  %s2462_s21 = sshll.u32 %s2665_s25, 4  ;;  %s2463_s21 = int_to_ptr.vmem [resolvable:$false] %s2462_s21 }
  0xba   : > { %p2458_p5 = scmp.ne.s32.totalorder %s564_s2, %s2457_s5  ;;  %s2464_s29 = scalar_lea.vmem %s2463_s21, 512 }
  0xbb   : > { %p2465_p8 = scmp.lt.s32.totalorder %s564_s2, %s2463_s21  ;;  %p2466_p13 = scmp.lt.s32.totalorder %s2464_s29, %s2457_s5 }
  0xbc   : > { %p2460_p12 = pnand %p2458_p5, %p2418_p10 }
  0xbd   : > { %s562_s6 = scalar_lea.hbm %s3397_s12, %s1881_s20  ;;  %p2467_p0 = por %p2466_p13, %p2465_p8 }
  0xbe   : > { %p2461_p6 = pneg %p2460_p12 }
  0xc0   : > { %p2468_p11 = pnand %p2467_p0, %p2461_p6 }
  0xc2   : > { %2471 = shalt.err (!%p2468_p11)
}
  0xc3   : > { %2046 = dma.hbm_to_vmem [thread:$0]  (!%p3005_p1), %s562_s6, 256, %s564_s2, %s2937_s15, %s2663_s28, %s2663_s28, %s2664_s9  }
  0xc4   : > { %575 = sbr.rel (%p2803_p3) target bundleno = 1227 (0x4cb), region = 68  ;;  %s3399_s20 = sld [smem:[#allocation32_spill]] (!%p2803_p3) }
  0xc5   : > { %s577_s11 = sand.u32 (!%p2803_p3), 1, %s2798_s19  }
  0xc6   : > { %s578_s0 = scalar_lea.sflag (!%p2803_p3), [#allocation3], %s577_s11 }
  0xca   : > { %s3032_s24 = sand.u32 1, %s3399_s20  }
  0xcb   : > { %s1832_s22 = sshll.u32 %s3032_s24, 3 }
  0xcc   : > { %s581_s14 = scalar_lea.vmem [#allocation2], %s1832_s22 }
  0xcd   : > { %2569 = dma.done.wait (%p2876_p4), %s578_s0, 128  }
  0xce   : > { %2571 = vsyncadd (%p2876_p4), %s578_s0, 4294967168  ;;  %s587_s15 = scalar_lea.sflag [#allocation6], %s577_s11  ;;  %s590_s13 = scalar_lea.vmem [#allocation5], %s1832_s22 }
  0xcf   : > { %2573 = dma.done.wait (%p2876_p4), %s587_s15, 128  }
  0xd0   : > { %2575 = vsyncadd (%p2876_p4), %s587_s15, 4294967168  ;;  %p3401_p3 = scmp.eq.s32.totalorder %s2798_s19, 0 }
  0xd2   : > { %2577 = dma.done.wait (%p3401_p3), [#allocation6], 128   ;;  %p3402_p1 = pmov %p3401_p3 }
  0xd4   : > { %2579 = vsyncadd (%p3402_p1), [#allocation6], 4294967168  ;;  %p3403_p10 = pmov %p3402_p1 }
  0xd5   : > { %p3404_p9 = pmov %p3402_p1 }
  0xd6   : > { %2581 = dma.done.wait (%p3403_p10), [#allocation9], 256  }
  0xd7   : > { %2583 = vsyncadd (%p3404_p9), [#allocation9], 4294967040  ;;  %p3405_p5 = pmov %p3402_p1 }
  0xd8   : > { %p3406_p12 = pmov %p3402_p1 }
  0xd9   : > { %2585 = dma.done.wait (%p3405_p5), [#allocation12], 256  }
  0xda   : > { %2587 = vsyncadd (%p3406_p12), [#allocation12], 4294967040  ;;  %p3407_p4 = pmov %p3402_p1 }
  0xdb   : > { %p3408_p6 = pmov %p3402_p1 }
  0xdc   : > { %2589 = dma.done.wait (%p3407_p4), [#allocation15], 128  }
  0xdd   : > { %2591 = vsyncadd (%p3408_p6), [#allocation15], 4294967168  ;;  %s621_s28 = sand.u32 1, %s2614_s26  }
  0xde   : > { %s3060_s9 = sshll.u32 %s621_s28, 4 }
  0xdf   : > { %s623_s12 = scalar_lea.vmem [#allocation16], %s3060_s9 }
  0xe0   : > { %2593 = dma.done.wait (%p2994_p2), %s578_s0, 256  }
  0xe1   : > { %2595 = vsyncadd (%p2994_p2), %s578_s0, 4294967040  ;;  %s632_s6 = scalar_lea.vmem [#allocation17], %s3060_s9 }
  0xe2   : > { %2597 = dma.done.wait (%p2994_p2), %s587_s15, 256  }
  0xe3   : > { %2599 = vsyncadd (%p2994_p2), %s587_s15, 4294967040  ;;  %v2666_v0 = vmov 0.0   ;;  %vm2667_vm0 = vmmov 0   ;;  %v696_v1 = vld [vmem:[%s581_s14] sm:$0xf]  ;;  %vm719_vm1 = vcmask 130048  }
  0xe4   : > { %1907 = vmatprep.subr.bf16.mxu0 %v2666_v0  ;;  %1913 = vmatprep.subr.bf16.mxu1 %v2666_v0  ;;  %v697_v2 = vld [vmem:[%s581_s14 + $0x4] sm:$0xf]  ;;  %v698_v3 = vld [vmem:[%s590_s13] sm:$0xf]  ;;  %v699_v5 = vld [vmem:[%s590_s13 + $0x4] sm:$0xf] }
  0xe5   : > { %1909 = vmatprep.mubr.msk.bf16.mxu0 %vm2667_vm0, %v2666_v0  ;;  %1915 = vmatprep.mubr.msk.bf16.mxu1 %vm2667_vm0, %v2666_v0  ;;  %v1845_v4 = vcombine.low %v696_v1, %v697_v2  ;;  %v706_v6 = vadd.bf16 %v698_v3, %v696_v1  ;;  %v700_v7 = vld [vmem:[#allocation7] sm:$0xf]  ;;  %v701_v8 = vld [vmem:[#allocation7 + $0x4] sm:$0xf]  ;;  %v707_v9 = vadd.bf16 %v699_v5, %v697_v2  ;;  %v702_v12 = vld [vmem:[#allocation8] sm:$0xf] }
  0xe6   : > { %v1848_v10 = vcombine.low %v698_v3, %v699_v5  ;;  %v1844_v11 = vcombine.low %v700_v7, %v701_v8  ;;  %v703_v13 = vld [vmem:[#allocation8 + $0x4] sm:$0xf]  ;;  %v704_v16 = vadd.bf16 %v702_v12, %v700_v7  ;;  %v880_v19 = vld [vmem:[#allocation10] sm:$0xf]  ;;  %v881_v20 = vld [vmem:[#allocation10 + $0x4] sm:$0xf] }
  0xe7   : > { %1908 = vmatpush3.bf16.msra.mxu0 %v1845_v4  ;;  %v1847_v14 = vcombine.low %v702_v12, %v703_v13  ;;  %v1851_v15 = vcombine.low %v706_v6, %v707_v9  ;;  %v705_v17 = vadd.bf16 %v703_v13, %v701_v8  ;;  %v1853_v21 = vcombine.low %v880_v19, %v881_v20  ;;  %s3409_s10 = sld [smem:[#allocation47_spill]]  ;;  %v1047_v2 = vld [vmem:[%s623_s12] sm:$0xff]  ;;  %v1048_v7 = vld [vmem:[%s623_s12 + $0x8] sm:$0xff]  ;;  %s1842_s0 = sshll.u32 %s3032_s24, 4 }
  0xe8   : > { %1914 = vmatpush3.bf16.msra.mxu1 %v1848_v10  ;;  %1919 = vmatprep.subr.bf16.mxu0 %v2666_v0  ;;  %v1049_v3 = vld [vmem:[%s632_s6] sm:$0xff]  ;;  %v1050_v8 = vld [vmem:[%s632_s6 + $0x8] sm:$0xff]  ;;  %s3410_s29 = sld [smem:[#allocation49_spill]]  ;;  %s687_s28 = scalar_lea.vmem [#allocation18], %s1842_s0 }
  0xe9   : > { %1925 = vmatprep.subr.bf16.mxu1 %v2666_v0  ;;  %v1850_v18 = vcombine.low %v704_v16, %v705_v17  ;;  %s3412_s11 = sld [smem:[#allocation34_spill]]  ;;  %s1541_s12 = sshll.u32 %s687_s28, 4  ;;  %s3200_s12 = int_to_ptr.vmem [resolvable:$true] %s1541_s12 }
  0xea   : > { %1910 = vmatmul.mubr.msk.bf16.vlgmr.msra.gmra.mxu0 %vm719_vm1, %v1844_v11  ;;  %s3413_s22 = sld [smem:[#allocation35_spill]]  ;;  %s1521_s25 = scalar_lea.sflag [#allocation4], %s3032_s24 }
  0xeb   : > { %1916 = vmatmul.mubr.msk.bf16.vlgmr.msra.gmra.mxu1 %vm719_vm1, %v1847_v14  ;;  %1920 = vmatpush3.bf16.msra.mxu0 %v1851_v15  ;;  %s3415_s2 = sld [smem:[#allocation52_spill]]  ;;  %s2472_s21 = scalar_lea.vmem %s3200_s12, 256 }
  0xec   : > { %1921 = vmatprep.mubr.msk.bf16.mxu0 %vm2667_vm0, %v2666_v0  ;;  %1927 = vmatprep.mubr.msk.bf16.mxu1 %vm2667_vm0, %v2666_v0  ;;  %p2473_p2 = scmp.ne.s32.totalorder %s3200_s12, %s2472_s21 }
  0xed   : > { %1931 = vmatprep.subr.bf16.mxu0 %v2666_v0  ;;  %1926 = vmatpush3.bf16.msra.mxu1 %v1853_v21  ;;  %v882_v22 = vld [vmem:[%s3409_s10] sm:$0xf]  ;;  %v883_v23 = vld [vmem:[%s3409_s10 + $0x4] sm:$0xf] }
  0xee   : > { %1937 = vmatprep.subr.bf16.mxu1 %v2666_v0  ;;  %v1855_v24 = vcombine.low %v882_v22, %v883_v23  ;;  %v887_v25 = vadd.bf16 %v882_v22, %v880_v19  ;;  %v888_v26 = vadd.bf16 %v883_v23, %v881_v20  ;;  %v1064_v23 = vld [vmem:[#allocation11 + $0x4] sm:$0xf]  ;;  %s3411_s20 = smov %s3410_s29  ;;  %p2474_p8 = pnand %p2473_p2, %p2880_p7 }
  0xef   : > { %s1873_s14 = sshll.u32 %s3412_s11, 1 }
  0xf0   : > { %v1857_v27 = vcombine.low %v887_v25, %v888_v26  ;;  %v1066_v25 = vld [vmem:[#allocation13 + $0x4] sm:$0xf]  ;;  %s1874_s15 = sshll.u32 %s3413_s22, 2  ;;  %p2475_p13 = pneg %p2474_p8 }
  0xf1   : > { %s3181_s13 = sadd.s32 %s1874_s15, %s1873_s14 }
  0xf2   : > { %1922 = vmatmul.mubr.msk.bf16.vlgmr.msra.gmra.mxu0 %vm719_vm1, %v1850_v18  ;;  %v1063_v18 = vld [vmem:[#allocation11] sm:$0xf]  ;;  %s1875_s9 = sshll.u32 %s3181_s13, 7 }
  0xf3   : > { %1933 = vmatprep.mubr.msk.bf16.mxu0 %vm2667_vm0, %v2666_v0  ;;  %1932 = vmatpush3.bf16.msra.mxu0 %v1855_v24  ;;  %v1065_v24 = vld [vmem:[#allocation13] sm:$0xf]  ;;  %s3198_s5 = scalar_lea.hbm %s3415_s2, %s1875_s9 }
  0xf4   : > { %1943 = vmatprep.subr.bf16.mxu0 %v2666_v0 }
 0x1aa   : > { %v757_v28 = vpop.f32.mrf.mxu0 }
 0x1ab   : > { %v812_v29 = vpop.f32.mrf.mxu1 }
 0x1ac   : > { %v1911_v30 = vpop.f32.mrf.mxu0  ;;  %v874_v34 = vsub.f32 %v757_v28, %v812_v29 }
 0x1ad   : > { %v1917_v31 = vpop.f32.mrf.mxu1  ;;  %v1861_v30 = vcombine.low %v1065_v24, %v1066_v25 }
 0x1ae   : > { %v760_v32 = vpop.f32.mrf.mxu0 }
 0x1af   : > { %v815_v33 = vpop.f32.mrf.mxu1 }
 0x1b0   : > { %v875_v35 = vsub.f32 %v760_v32, %v815_v33  ;;  %v1912_v36 = vpop.f32.mrf.mxu0 }
 0x1b1   : > { %v1918_v37 = vpop.f32.mrf.mxu1  ;;  %v1227_v36 = vld [vmem:[#allocation14] sm:$0xf] }
 0x1b2   : > { %v889_v38 = vpack.c.bf16 %v875_v35, %v874_v34  ;;  %v867_v39 = vpop.f32.mrf.mxu0  ;;  %v1228_v37 = vld [vmem:[#allocation14 + $0x4] sm:$0xf] }
 0x1b3   : > { %v876_v40 = vsub.f32 %v867_v39, %v757_v28  ;;  %v1229_v39 = vld [vmem:[%s3410_s29] sm:$0xf]  ;;  %s2668_s29 = smov [#allocation18]  }
 0x1b4   : > { %1928 = vmatmul.mubr.msk.bf16.vlgmr.msra.gmra.mxu1 %vm719_vm1, %v889_v38  ;;  %v1923_v41 = vpop.f32.mrf.mxu0  ;;  %v1865_v38 = vcombine.low %v1227_v36, %v1228_v37  ;;  %s2476_s16 = sshll.u32 %s2668_s29, 4  ;;  %s2477_s16 = int_to_ptr.vmem [resolvable:$false] %s2476_s16 }
 0x1b5   : > { %1938 = vmatpush3.bf16.msra.mxu1 %v1857_v27  ;;  %1939 = vmatprep.mubr.msk.bf16.mxu1 %vm2667_vm0, %v2666_v0  ;;  %v878_v43 = vsub.f32 %v876_v40, %v812_v29  ;;  %v1859_v29 = vcombine.low %v1063_v18, %v1064_v23  ;;  %v1230_v40 = vld [vmem:[%s3411_s20 + $0x4] sm:$0xf]  ;;  %s2478_s3 = scalar_lea.vmem %s2477_s16, 512  ;;  %p2479_p0 = scmp.lt.s32.totalorder %s3200_s12, %s2477_s16 }
 0x1b6   : > { %v870_v42 = vpop.f32.mrf.mxu0  ;;  %1949 = vmatprep.subr.bf16.mxu1 %v2666_v0  ;;  %v1867_v41 = vcombine.low %v1229_v39, %v1230_v40  ;;  %p2480_p11 = scmp.lt.s32.totalorder %s2478_s3, %s2472_s21 }
 0x1b7   : > { %v877_v44 = vsub.f32 %v870_v42, %v760_v32  ;;  %v884_v47 = vadd.f32 %v878_v43, %v874_v34  ;;  %v1068_v34 = vadd.bf16 %v1066_v25, %v1064_v23  ;;  %v1234_v42 = vadd.bf16 %v1229_v39, %v1227_v36 }
 0x1b8   : > { %v1924_v45 = vpop.f32.mrf.mxu0  ;;  %p2481_p3 = por %p2480_p11, %p2479_p0 }
 0x1b9   : > { %v879_v46 = vsub.f32 %v877_v44, %v815_v33  ;;  %v1067_v33 = vadd.bf16 %v1065_v24, %v1063_v18 }
 0x1ba   : > { %p2482_p1 = pnand %p2481_p3, %p2475_p13 }
 0x1bb   : > { %v885_v48 = vadd.f32 %v879_v46, %v875_v35  ;;  %v890_v49 = vpack.c.bf16 %v879_v46, %v878_v43  ;;  %v1863_v35 = vcombine.low %v1067_v33, %v1068_v34  ;;  %v1235_v43 = vadd.bf16 %v1230_v40, %v1228_v37 }
 0x1bd   : > { %v886_v50 = vpack.c.bf16 %v885_v48, %v884_v47  ;;  %1934 = vmatmul.mubr.msk.bf16.vlgmr.msra.gmra.mxu0 %vm719_vm1, %v890_v49  ;;  %v1869_v44 = vcombine.low %v1234_v42, %v1235_v43 }
 0x1be   : > { %1945 = vmatprep.mubr.msk.bf16.mxu0 %vm2667_vm0, %v2666_v0 }
 0x1bf   : > { %1940 = vmatmul.mubr.msk.bf16.vlgmr.msra.gmra.mxu1 %vm719_vm1, %v886_v50 }
 0x1c0   : > { %1951 = vmatprep.mubr.msk.bf16.mxu1 %vm2667_vm0, %v2666_v0 }
 0x274   : > { %v934_v51 = vpop.f32.mrf.mxu1 }
 0x276   : > { %v1929_v52 = vpop.f32.mrf.mxu1 }
 0x278   : > { %v937_v53 = vpop.f32.mrf.mxu1 }
 0x27a   : > { %v1930_v54 = vpop.f32.mrf.mxu1 }
 0x27d   : > { %v984_v55 = vpop.f32.mrf.mxu0 }
 0x27e   : > { %v1041_v1 = vsub.f32 %v934_v51, %v984_v55 }
 0x27f   : > { %v1935_v56 = vpop.f32.mrf.mxu0  ;;  %v1034_v57 = vpop.f32.mrf.mxu1 }
 0x280   : > { %v1043_v58 = vsub.f32 %v1034_v57, %v934_v51  ;;  %v1051_v12 = vmul.f32 %v1047_v2, %v1041_v1  ;;  %v1057_v13 = vmul.f32 %v1049_v3, %v1041_v1 }
 0x281   : > { %v987_v59 = vpop.f32.mrf.mxu0  ;;  %v1941_v60 = vpop.f32.mrf.mxu1 }
 0x282   : > { %v1045_v61 = vsub.f32 %v1043_v58, %v984_v55  ;;  %v1042_v4 = vsub.f32 %v937_v53, %v987_v59 }
 0x283   : > { %v1936_v62 = vpop.f32.mrf.mxu0  ;;  %v1037_v63 = vpop.f32.mrf.mxu1 }
 0x284   : > { %v1044_v5 = vsub.f32 %v1037_v63, %v937_v53  ;;  %v1053_v9 = vmul.f32 %v1049_v3, %v1045_v61  ;;  %v1059_v10 = vmul.f32 %v1047_v2, %v1045_v61  ;;  %v1052_v14 = vmul.f32 %v1048_v7, %v1042_v4 }
 0x285   : > { %v1942_v6 = vpop.f32.mrf.mxu1  ;;  %v1058_v15 = vmul.f32 %v1050_v8, %v1042_v4 }
 0x286   : > { %v1046_v11 = vsub.f32 %v1044_v5, %v987_v59  ;;  %v1055_v19 = vsub.f32 %v1051_v12, %v1053_v9  ;;  %v1061_v20 = vadd.f32 %v1059_v10, %v1057_v13 }
 0x288   : > { %v1054_v16 = vmul.f32 %v1050_v8, %v1046_v11  ;;  %v1060_v17 = vmul.f32 %v1048_v7, %v1046_v11  ;;  %v1069_v31 = vadd.f32 %v1061_v20, %v1055_v19 }
 0x28a   : > { %v1056_v21 = vsub.f32 %v1052_v14, %v1054_v16  ;;  %v1062_v22 = vadd.f32 %v1060_v17, %v1058_v15 }
 0x28c   : > { %v1070_v26 = vadd.f32 %v1062_v22, %v1056_v21  ;;  %v1072_v27 = vpack.c.bf16 %v1056_v21, %v1055_v19  ;;  %v1073_v28 = vpack.c.bf16 %v1062_v22, %v1061_v20 }
 0x28e   : > { %1944 = vmatpush3.bf16.msra.mxu0 %v1072_v27  ;;  %1950 = vmatpush3.bf16.msra.mxu1 %v1073_v28  ;;  %v1071_v32 = vpack.c.bf16 %v1070_v26, %v1069_v31 }
 0x28f   : > { %1955 = vmatprep.subr.bf16.mxu0 %v2666_v0  ;;  %1961 = vmatprep.subr.bf16.mxu1 %v2666_v0 }
 0x291   : > { %1946 = vmatmul.mubr.msk.bf16.vlgmr.msra.gmra.mxu0 %vm719_vm1, %v1859_v29  ;;  %1952 = vmatmul.mubr.msk.bf16.vlgmr.msra.gmra.mxu1 %vm719_vm1, %v1861_v30 }
 0x292   : > { %1956 = vmatpush3.bf16.msra.mxu0 %v1071_v32  ;;  %1957 = vmatprep.mubr.msk.bf16.mxu0 %vm2667_vm0, %v2666_v0 }
 0x293   : > { %1963 = vmatprep.mubr.msk.bf16.mxu1 %vm2667_vm0, %v2666_v0  ;;  %1967 = vmatprep.subr.bf16.mxu0 %v2666_v0 }
 0x294   : > { %1962 = vmatpush3.bf16.msra.mxu1 %v1865_v38 }
 0x295   : > { %1973 = vmatprep.subr.bf16.mxu1 %v2666_v0 }
 0x299   : > { %1958 = vmatmul.mubr.msk.bf16.vlgmr.msra.gmra.mxu0 %vm719_vm1, %v1863_v35 }
 0x29a   : > { %1969 = vmatprep.mubr.msk.bf16.mxu0 %vm2667_vm0, %v2666_v0  ;;  %1968 = vmatpush3.bf16.msra.mxu0 %v1867_v41 }
 0x351   : > { %v1116_v45 = vpop.f32.mrf.mxu0  ;;  %v1165_v46 = vpop.f32.mrf.mxu1 }
 0x352   : > { %v1221_v51 = vsub.f32 %v1116_v45, %v1165_v46 }
 0x353   : > { %v1947_v47 = vpop.f32.mrf.mxu0  ;;  %v1953_v48 = vpop.f32.mrf.mxu1 }
 0x355   : > { %v1119_v49 = vpop.f32.mrf.mxu0  ;;  %v1168_v50 = vpop.f32.mrf.mxu1 }
 0x356   : > { %v1222_v52 = vsub.f32 %v1119_v49, %v1168_v50 }
 0x357   : > { %v1948_v53 = vpop.f32.mrf.mxu0  ;;  %v1954_v54 = vpop.f32.mrf.mxu1 }
 0x358   : > { %v1236_v55 = vpack.c.bf16 %v1222_v52, %v1221_v51 }
 0x359   : > { %v1214_v56 = vpop.f32.mrf.mxu0 }
 0x35a   : > { %v1223_v57 = vsub.f32 %v1214_v56, %v1116_v45  ;;  %1964 = vmatmul.mubr.msk.bf16.vlgmr.msra.gmra.mxu1 %vm719_vm1, %v1236_v55 }
 0x35b   : > { %v1959_v58 = vpop.f32.mrf.mxu0  ;;  %1974 = vmatpush3.bf16.msra.mxu1 %v1869_v44  ;;  %1975 = vmatprep.mubr.msk.bf16.mxu1 %vm2667_vm0, %v2666_v0 }
 0x35c   : > { %v1225_v60 = vsub.f32 %v1223_v57, %v1165_v46 }
 0x35d   : > { %v1217_v59 = vpop.f32.mrf.mxu0 }
 0x35e   : > { %v1224_v61 = vsub.f32 %v1217_v59, %v1119_v49  ;;  %v1231_v1 = vadd.f32 %v1225_v60, %v1221_v51 }
 0x35f   : > { %v1960_v62 = vpop.f32.mrf.mxu0 }
 0x360   : > { %v1226_v63 = vsub.f32 %v1224_v61, %v1168_v50 }
 0x362   : > { %v1232_v2 = vadd.f32 %v1226_v63, %v1222_v52  ;;  %v1237_v3 = vpack.c.bf16 %v1226_v63, %v1225_v60 }
 0x364   : > { %v1233_v4 = vpack.c.bf16 %v1232_v2, %v1231_v1  ;;  %1970 = vmatmul.mubr.msk.bf16.vlgmr.msra.gmra.mxu0 %vm719_vm1, %v1237_v3 }
 0x366   : > { %1976 = vmatmul.mubr.msk.bf16.vlgmr.msra.gmra.mxu1 %vm719_vm1, %v1233_v4 }
 0x41a   : > { %v1281_v5 = vpop.f32.mrf.mxu1 }
 0x41c   : > { %v1965_v6 = vpop.f32.mrf.mxu1 }
 0x41e   : > { %v1284_v7 = vpop.f32.mrf.mxu1 }
 0x420   : > { %v1966_v8 = vpop.f32.mrf.mxu1 }
 0x424   : > { %v1331_v9 = vpop.f32.mrf.mxu0 }
 0x425   : > { %v3140_v11 = vsub.f32 %v1281_v5, %v1331_v9 }
 0x426   : > { %v1971_v10 = vpop.f32.mrf.mxu0  ;;  %v1381_v0 = vpop.f32.mrf.mxu1 }
 0x427   : > { %v1390_v12 = vsub.f32 %v1381_v0, %v1281_v5  ;;  %v1394_v18 = vmul.f32 %v3140_v11, %v3140_v11  ;;  %v3147_v19 = vand.u32 2147483647, %v3140_v11 }
 0x428   : > { %v1334_v13 = vpop.f32.mrf.mxu0  ;;  %v1977_v14 = vpop.f32.mrf.mxu1 }
 0x429   : > { %v3142_v15 = vsub.f32 %v1390_v12, %v1331_v9  ;;  %v3154_v22 = vsub.f32 %v1284_v7, %v1334_v13 }
 0x42a   : > { %v1972_v16 = vpop.f32.mrf.mxu0  ;;  %v1384_v17 = vpop.f32.mrf.mxu1 }
 0x42b   : > { %v1396_v20 = vmul.f32 %v3142_v15, %v3142_v15  ;;  %v3152_v21 = vand.u32 2147483647, %v3142_v15  ;;  %v1391_v23 = vsub.f32 %v1384_v17, %v1284_v7  ;;  %v1395_v29 = vmul.f32 %v3154_v22, %v3154_v22 }
 0x42c   : > { %v1978_v24 = vpop.f32.mrf.mxu1  ;;  %v3165_v30 = vand.u32 2147483647, %v3154_v22 }
 0x42d   : > { %v1398_v25 = vadd.f32 %v1396_v20, %v1394_v18  ;;  %v1420_v26 = vmax.f32 %v3147_v19, %v3152_v21  ;;  %vm1500_vm2 = vcmp.gt.f32.partialorder %v3152_v21, %v3147_v19  ;;  %v3160_v27 = vsub.f32 %v1391_v23, %v1334_v13 }
 0x42e   : > { %v1422_v37 = vmin.f32 %v3147_v19, %v3152_v21 }
 0x42f   : > { %2180 = vrsqrt.f32 %v1398_v25  ;;  %v1424_v28 = vmax.f32 %v1420_v26, 1e-30  ;;  %v1397_v31 = vmul.f32 %v3160_v27, %v3160_v27  ;;  %v3170_v32 = vand.u32 2147483647, %v3160_v27 }
 0x430   : > { %vm1402_vm4 = vcmp.eq.f32.partialorder %v1398_v25, inf  ;;  %v1405_v40 = vand.u32 2147483648, %v1398_v25  ;;  %vm1404_vm5 = vcmp.eq.f32.partialorder %v1398_v25, 0.0 }
 0x431   : > { %2182 = vrcp.f32 %v1424_v28  ;;  %v1399_v33 = vadd.f32 %v1397_v31, %v1395_v29  ;;  %v1421_v34 = vmax.f32 %v3165_v30, %v3170_v32  ;;  %vm1501_vm3 = vcmp.gt.f32.partialorder %v3170_v32, %v3165_v30 }
 0x432   : > { %v1423_v46 = vmin.f32 %v3165_v30, %v3170_v32 }
 0x433   : > { %2184 = vrsqrt.f32 %v1399_v33  ;;  %v1425_v35 = vmax.f32 %v1421_v34, 1e-30  ;;  %vm1409_vm6 = vcmp.eq.f32.partialorder %v1399_v33, inf  ;;  %v1412_v52 = vand.u32 2147483648, %v1399_v33 }
 0x434   : > { %vm1411_vm7 = vcmp.eq.f32.partialorder %v1399_v33, 0.0 }
 0x435   : > { %2186 = vrcp.f32 %v1425_v35 }
 0x43c   : > { %v2181_v36 = vpop.eup %2180 }
 0x43d   : > { %v1401_v38 = vmul.f32 %v2181_v36, %v1398_v25 }
 0x43e   : > { %v2183_v39 = vpop.eup %2182 }
 0x43f   : > { %v3183_v41 = vmul.f32 %v2183_v39, %v1422_v37  ;;  %v1403_v42 = vsel %vm1402_vm4, %v1398_v25, %v1401_v38 }
 0x440   : > { %v1406_v43 = vsel %vm1404_vm5, %v1405_v40, %v1403_v42  ;;  %v2185_v44 = vpop.eup %2184 }
 0x441   : > { %v1430_v45 = vmul.f32 %v3183_v41, %v3183_v41  ;;  %1414 = vst.msk [vmem:[%s687_s28] sm:$0xff] %vm719_vm1, %v1406_v43  ;;  %v1408_v47 = vmul.f32 %v2185_v44, %v1399_v33 }
 0x442   : > { %v2187_v48 = vpop.eup %2186 }
 0x443   : > { %v1432_v49 = vadd.f32 1.0, %v1430_v45  ;;  %v1429_v50 = vmul.f32 %v2187_v48, %v1423_v46  ;;  %v1410_v51 = vsel %vm1409_vm6, %v1399_v33, %v1408_v47 }
 0x444   : > { %v1413_v54 = vsel %vm1411_vm7, %v1412_v52, %v1410_v51 }
 0x445   : > { %2188 = vrsqrt.f32 %v1432_v49  ;;  %v1431_v53 = vmul.f32 %v1429_v50, %v1429_v50  ;;  %1415 = vst.msk [vmem:[%s687_s28 + $0x8] sm:$0xff] %vm719_vm1, %v1413_v54 }
 0x447   : > { %v1433_v55 = vadd.f32 1.0, %v1431_v53 }
 0x448   : > { %2485 = shalt.err (!%p2482_p1)
}
 0x449   : > { %s2486_s11 = scalar_lea.hbm %s3198_s5, 256  ;;  %s2490_s15 = scalar_lea.hbm %s3415_s2, 1536 }
 0x44a   : > { %p2487_p10 = scmp.ne.s32.totalorder %s3198_s5, %s2486_s11  ;;  %p2491_p12 = scmp.lt.s32.totalorder %s3198_s5, %s3415_s2 }
 0x44b   : > { %p2492_p4 = scmp.lt.s32.totalorder %s2490_s15, %s2486_s11 }
 0x44c   : > { %p2488_p9 = pnand %p2487_p10, %p2880_p7 }
 0x44d   : > { %p2493_p6 = por %p2492_p4, %p2491_p12 }
 0x44e   : > { %p2489_p5 = pneg %p2488_p9 }
 0x450   : > { %p2494_p2 = pnand %p2493_p6, %p2489_p5 }
 0x452   : > { %2497 = shalt.err (!%p2494_p2)
}
 0x453   : > { %s2669_s30 = smov 128   ;;  %s2670_s21 = smov 8   ;;  %2190 = vrsqrt.f32 %v1433_v55  ;;  %v2189_v56 = vpop.eup %2188  ;;  %vm1436_vm8 = vcmp.eq.f32.partialorder %v1432_v49, inf  ;;  %v1439_v58 = vand.u32 2147483648, %v1432_v49  ;;  %vm1438_vm9 = vcmp.eq.f32.partialorder %v1432_v49, 0.0 }
 0x454   : > { %2011 = dma.vmem_to_hbm [thread:$0]  (%p2880_p7), %s3200_s12, 256, %s3198_s5, %s1521_s25, %s2669_s30, %s2669_s30, %s2670_s21   ;;  %v1435_v57 = vmul.f32 %v2189_v56, %v1432_v49  ;;  %vm1443_vm10 = vcmp.eq.f32.partialorder %v1433_v55, inf  ;;  %v1446_v1 = vand.u32 2147483648, %v1433_v55  ;;  %vm1445_vm11 = vcmp.eq.f32.partialorder %v1433_v55, 0.0 }
 0x455   : > { %vm1506_vm0 = vcmp.lt.f32.partialorder %v3140_v11, 0.0  ;;  %vm1512_vm4 = vcmp.lt.f32.partialorder %v3142_v15, 0.0  ;;  %s694_s12 = scalar_lea.vmem [#allocation19], %s1842_s0  ;;  %vm1513_vm5 = vcmp.lt.f32.partialorder %v3160_v27, 0.0  ;;  %s3416_s16 = sld [smem:[#allocation53_spill]] }
 0x456   : > { %v1437_v59 = vsel %vm1436_vm8, %v1432_v49, %v1435_v57  ;;  %s1559_s5 = sshll.u32 %s694_s12, 4  ;;  %s1526_s0 = scalar_lea.sflag [#allocation20], %s3032_s24  ;;  %s3250_s5 = int_to_ptr.vmem [resolvable:$true] %s1559_s5 }
 0x457   : > { %v1440_v60 = vsel %vm1438_vm9, %v1439_v58, %v1437_v59  ;;  %s2498_s22 = scalar_lea.vmem %s3250_s5, 256  ;;  %s2671_s13 = smov [#allocation19]  }
 0x458   : > { %v1448_v62 = vadd.f32 1.0, %v1440_v60  ;;  %p2499_p8 = scmp.ne.s32.totalorder %s3250_s5, %s2498_s22  ;;  %s2502_s14 = sshll.u32 %s2671_s13, 4  ;;  %s2503_s14 = int_to_ptr.vmem [resolvable:$false] %s2502_s14 }
 0x459   : > { %s2504_s15 = scalar_lea.vmem %s2503_s14, 512  ;;  %p2505_p11 = scmp.lt.s32.totalorder %s3250_s5, %s2503_s14 }
 0x45a   : > { %2192 = vrcp.f32 %v1448_v62  ;;  %p2500_p13 = pnand %p2499_p8, %p2880_p7  ;;  %p2506_p3 = scmp.lt.s32.totalorder %s2504_s15, %s2498_s22 }
 0x45b   : > { %s3417_s3 = smov %s3416_s16  ;;  %s3248_s11 = scalar_lea.hbm %s3416_s16, %s1875_s9 }
 0x45c   : > { %p2501_p0 = pneg %p2500_p13  ;;  %p2507_p1 = por %p2506_p3, %p2505_p11 }
 0x45e   : > { %p2508_p10 = pnand %p2507_p1, %p2501_p0 }
 0x460   : > { %v2191_v61 = vpop.eup %2190 }
 0x461   : > { %v1442_v63 = vmul.f32 %v2191_v61, %v1433_v55 }
 0x463   : > { %v1444_v2 = vsel %vm1443_vm10, %v1433_v55, %v1442_v63 }
 0x464   : > { %v1447_v3 = vsel %vm1445_vm11, %v1446_v1, %v1444_v2 }
 0x465   : > { %v1449_v4 = vadd.f32 1.0, %v1447_v3 }
 0x467   : > { %2194 = vrcp.f32 %v1449_v4  ;;  %v2193_v5 = vpop.eup %2192 }
 0x468   : > { %v1451_v6 = vmul.f32 %v2193_v5, %v3183_v41 }
 0x46a   : > { %v1454_v7 = vmul.f32 %v1451_v6, %v1451_v6 }
 0x46c   : > { %v1456_v9 = vadd.f32 1.0, %v1454_v7 }
 0x46e   : > { %2196 = vrsqrt.f32 %v1456_v9  ;;  %vm1460_vm12 = vcmp.eq.f32.partialorder %v1456_v9, inf  ;;  %v1463_v16 = vand.u32 2147483648, %v1456_v9  ;;  %vm1462_vm13 = vcmp.eq.f32.partialorder %v1456_v9, 0.0 }
 0x474   : > { %v2195_v8 = vpop.eup %2194 }
 0x475   : > { %v1453_v10 = vmul.f32 %v2195_v8, %v1429_v50 }
 0x477   : > { %v1455_v0 = vmul.f32 %v1453_v10, %v1453_v10 }
 0x479   : > { %v1457_v12 = vadd.f32 1.0, %v1455_v0 }
 0x47b   : > { %2198 = vrsqrt.f32 %v1457_v12  ;;  %v2197_v13 = vpop.eup %2196  ;;  %vm1467_vm14 = vcmp.eq.f32.partialorder %v1457_v12, inf  ;;  %v1470_v25 = vand.u32 2147483648, %v1457_v12  ;;  %vm1469_vm15 = vcmp.eq.f32.partialorder %v1457_v12, 0.0 }
 0x47c   : > { %v1459_v14 = vmul.f32 %v2197_v13, %v1456_v9 }
 0x47e   : > { %v1461_v17 = vsel %vm1460_vm12, %v1456_v9, %v1459_v14 }
 0x47f   : > { %v1464_v18 = vsel %vm1462_vm13, %v1463_v16, %v1461_v17 }
 0x480   : > { %v1472_v23 = vadd.f32 1.0, %v1464_v18 }
 0x482   : > { %2200 = vrcp.f32 %v1472_v23 }
 0x488   : > { %v2199_v20 = vpop.eup %2198 }
 0x489   : > { %v1466_v24 = vmul.f32 %v2199_v20, %v1457_v12 }
 0x48b   : > { %v1468_v26 = vsel %vm1467_vm14, %v1457_v12, %v1466_v24 }
 0x48c   : > { %v1471_v28 = vsel %vm1469_vm15, %v1470_v25, %v1468_v26 }
 0x48d   : > { %v1473_v29 = vadd.f32 1.0, %v1471_v28 }
 0x48f   : > { %2202 = vrcp.f32 %v1473_v29  ;;  %v2201_v31 = vpop.eup %2200 }
 0x490   : > { %v1475_v33 = vmul.f32 %v2201_v31, %v1451_v6 }
 0x492   : > { %v1478_v34 = vmul.f32 %v1475_v33, %v1475_v33 }
 0x494   : > { %v1480_v36 = vmul.f32 0.11111111, %v1478_v34 }
 0x496   : > { %v1482_v38 = vadd.f32 -0.14285715, %v1480_v36 }
 0x498   : > { %v1484_v40 = vmul.f32 %v1482_v38, %v1478_v34 }
 0x49a   : > { %v1486_v42 = vadd.f32 0.2, %v1484_v40 }
 0x49c   : > { %v2203_v35 = vpop.eup %2202  ;;  %v1488_v44 = vmul.f32 %v1486_v42, %v1478_v34 }
 0x49d   : > { %v1477_v37 = vmul.f32 %v2203_v35, %v1453_v10 }
 0x49e   : > { %v1490_v46 = vadd.f32 -0.33333334, %v1488_v44 }
 0x49f   : > { %v1479_v39 = vmul.f32 %v1477_v37, %v1477_v37 }
 0x4a0   : > { %v1492_v48 = vmul.f32 %v1490_v46, %v1478_v34 }
 0x4a1   : > { %v1481_v41 = vmul.f32 0.11111111, %v1479_v39 }
 0x4a2   : > { %v1494_v50 = vadd.f32 1.0, %v1492_v48 }
 0x4a3   : > { %v1483_v43 = vadd.f32 -0.14285715, %v1481_v41 }
 0x4a4   : > { %v1496_v52 = vmul.f32 %v1494_v50, %v1475_v33 }
 0x4a5   : > { %v1485_v45 = vmul.f32 %v1483_v43, %v1479_v39 }
 0x4a6   : > { %v1498_v54 = vmul.f32 4.0, %v1496_v52 }
 0x4a7   : > { %v1487_v47 = vadd.f32 0.2, %v1485_v45 }
 0x4a8   : > { %v1502_v56 = vsub.f32 1.5707964, %v1498_v54 }
 0x4a9   : > { %v1489_v49 = vmul.f32 %v1487_v47, %v1479_v39 }
 0x4aa   : > { %v1504_v58 = vsel %vm1500_vm2, %v1502_v56, %v1498_v54  ;;  %vm1507_vm2 = vcmp.lt.f32.partialorder %v3154_v22, 0.0 }
 0x4ab   : > { %v1491_v51 = vadd.f32 -0.33333334, %v1489_v49  ;;  %v1508_v59 = vsub.f32 3.1415927, %v1504_v58 }
 0x4ad   : > { %v1493_v53 = vmul.f32 %v1491_v51, %v1479_v39  ;;  %v1510_v61 = vsel %vm1506_vm0, %v1508_v59, %v1504_v58 }
 0x4ae   : > { %v1514_v63 = vsub.f32 0.0, %v1510_v61 }
 0x4af   : > { %v1495_v55 = vadd.f32 1.0, %v1493_v53 }
 0x4b0   : > { %v1516_v2 = vsel %vm1512_vm4, %v1514_v63, %v1510_v61 }
 0x4b1   : > { %v1497_v57 = vmul.f32 %v1495_v55, %v1477_v37  ;;  %1518 = vst.msk [vmem:[%s694_s12] sm:$0xff] %vm719_vm1, %v1516_v2 }
 0x4b3   : > { %v1499_v60 = vmul.f32 4.0, %v1497_v57 }
 0x4b5   : > { %v1503_v62 = vsub.f32 1.5707964, %v1499_v60 }
 0x4b7   : > { %v1505_v1 = vsel %vm1501_vm3, %v1503_v62, %v1499_v60 }
 0x4b8   : > { %v1509_v3 = vsub.f32 3.1415927, %v1505_v1 }
 0x4ba   : > { %v1511_v11 = vsel %vm1507_vm2, %v1509_v3, %v1505_v1 }
 0x4bb   : > { %v1515_v19 = vsub.f32 0.0, %v1511_v11 }
 0x4bd   : > { %v1517_v15 = vsel %vm1513_vm5, %v1515_v19, %v1511_v11 }
 0x4be   : > { %1519 = vst.msk [vmem:[%s694_s12 + $0x8] sm:$0xff] %vm719_vm1, %v1517_v15 }
 0x4bf   : > { %2511 = shalt.err (!%p2508_p10)
}
 0x4c0   : > { %s2512_s9 = scalar_lea.hbm %s3248_s11, 256  ;;  %s2516_s19 = scalar_lea.hbm %s3417_s3, 1536 }
 0x4c1   : > { %p2513_p9 = scmp.ne.s32.totalorder %s3248_s11, %s2512_s9  ;;  %p2517_p4 = scmp.lt.s32.totalorder %s3248_s11, %s3417_s3 }
 0x4c2   : > { %p2518_p6 = scmp.lt.s32.totalorder %s2516_s19, %s2512_s9 }
 0x4c3   : > { %p2514_p5 = pnand %p2513_p9, %p2880_p7 }
 0x4c4   : > { %p2519_p2 = por %p2518_p6, %p2517_p4 }
 0x4c5   : > { %p2515_p12 = pneg %p2514_p5 }
 0x4c7   : > { %p2520_p8 = pnand %p2519_p2, %p2515_p12 }
 0x4c9   : > { %2523 = shalt.err (!%p2520_p8)
}
 0x4ca   : > { %2012 = dma.vmem_to_hbm [thread:$0]  (%p2880_p7), %s3250_s5, 256, %s3248_s11, %s1526_s0, %s2669_s30, %s2669_s30, %s2670_s21  }
 0x4cb PF: > { %s3418_s29 = sld [smem:[#allocation31_spill]]  ;;  %p2067_p13 = scmp.ge.s32.totalorder %s2650_s18, 2 }
 0x4cc   : > { %s3419_s16 = sld [smem:[#allocation42_spill]] }
 0x4d1   : > { %s1574_s22 = sand.u32 1, %s3418_s29  }
 0x4d2   : > { %p3420_p0 = scmp.ne.s32.totalorder %s3419_s16, 0  ;;  %s1575_s13 = scalar_lea.sflag [#allocation4], %s1574_s22 }
 0x4d4   : > { %p2048_p11 = pnand %p2067_p13, %p3420_p0 }
 0x4d6   : > { %p2049_p3 = pneg %p2048_p11 }
 0x4d8   : > { %2601 = dma.done.wait (%p2049_p3), %s1575_s13, 256  }
 0x4d9   : > { %2603 = vsyncadd (%p2049_p3), %s1575_s13, 4294967040  ;;  %s1584_s14 = scalar_lea.sflag [#allocation20], %s1574_s22 }
 0x4da   : > { %2605 = dma.done.wait (%p2049_p3), %s1584_s14, 256  }
 0x4db   : > { %2607 = vsyncadd (%p2049_p3), %s1584_s14, 4294967040  ;;  %s39_s18 = sadd.s32 1, %s2650_s18   ;;  %s3421_s28 = sld [smem:[#allocation32_spill]] }
 0x4dc   : > { %p36_p1 = scmp.ge.s32.totalorder %s39_s18, 8   ;;  %s3422_s29 = sld [smem:[#allocation33_spill]] }
 0x4dd   : > { %s3423_s30 = sld [smem:[#allocation43_spill]]  ;;  %s3427_s25 = smov %s2614_s26 }
 0x4de   : > { %s3424_s14 = sld [smem:[#allocation36_spill]]  ;;  %s3428_s26 = smov %s2618_s27 }
 0x4df   : > { %s3425_s16 = sld [smem:[#allocation38_spill]]  ;;  %s3429_s27 = smov %s2984_s23 }
 0x4e0   : > { %s3426_s6 = sld [smem:[#allocation39_spill]]  ;;  %s3430_s15 = smov %s2646_s17 }
 0x4e2   :  { %38 = sbr.rel (!%p36_p1) target bundleno = 27 (0x1b), region = 189 }
 0x4e6   : > { %s3431_s17 = smov %s3426_s6 }
 0x4e7   :  { %1589 = vsyncpa [#allocation3], 1 }
 0x4e8   :  { %1591 = vsyncpa [#allocation3 + $0x1], 1 }
 0x4e9   :  { %1592 = vsyncpa [#allocation6], 1 }
 0x4ea   :  { %1594 = vsyncpa [#allocation6 + $0x1], 1 }
 0x4eb   :  { %1595 = vsyncpa [#allocation9], 1 }
 0x4ec   :  { %1596 = vsyncpa [#allocation12], 1 }
 0x4ed   :  { %1597 = vsyncpa [#allocation15], 1 }
 0x4ee   :  { %1598 = vsyncpa [#allocation4], 1 }
 0x4ef   :  { %1600 = vsyncpa [#allocation4 + $0x1], 1 }
 0x4f0   :  { %1601 = vsyncpa [#allocation20], 1 }
 0x4f1   :  { %1603 = vsyncpa [#allocation20 + $0x1], 1 }

</bundles_post_ra>
